<compile_context>
chip_gen: v6e
topology: v6e:2x2x1
jax: 0.10.0
libtpu: 0.0.40
codegen_flags: <defaults>
</compile_context>

<pallas_src>
import functools

import jax
import jax.numpy as jnp
from jax import lax
from jax.experimental import pallas as pl
from jax.experimental.pallas import tpu as pltpu

EPS = 1e-5


def _round_up(a, b):
    return (a + b - 1) // b * b


def _fwp_kernel(x_ref, gw_ref, scal_ref, o_ref, sx_ref, sxx_ref, sxgw_ref, *, inv_n):
    # x_ref:   (TK, TN) tile of x (n_pixels on sublanes, columns on lanes)
    # gw_ref:  (TK, 1)  tile of gamma*w (broadcast along lanes)
    # scal_ref: SMEM (2,) = [sum(gamma*w), sum(beta*w) + b]
    # o_ref:   (1, TN) lane-dense output row
    # s*_ref:  (1, TN) f32 accumulators (persist across the reduction axis)
    k = pl.program_id(1)

    @pl.when(k == 0)
    def _():
        sx_ref[...] = jnp.zeros_like(sx_ref)
        sxx_ref[...] = jnp.zeros_like(sxx_ref)
        sxgw_ref[...] = jnp.zeros_like(sxgw_ref)

    x = x_ref[...].astype(jnp.float32)
    gw = gw_ref[...].astype(jnp.float32)              # (TK, 1) -> lane broadcast
    sx_ref[...] += jnp.sum(x, axis=0, keepdims=True)
    sxx_ref[...] += jnp.sum(x * x, axis=0, keepdims=True)
    sxgw_ref[...] += jnp.sum(x * gw, axis=0, keepdims=True)

    @pl.when(k == pl.num_programs(1) - 1)
    def _():
        mean = sx_ref[...] * inv_n
        # One-pass variance (biased, matches nn.LayerNorm up to f32 rounding).
        var = sxx_ref[...] * inv_n - mean * mean
        inv = lax.rsqrt(var + EPS)
        s_gw = scal_ref[0]
        s_bw = scal_ref[1]
        proj = inv * (sxgw_ref[...] - mean * s_gw) + s_bw
        o_ref[...] = proj.astype(o_ref.dtype)


def featurewise_projection(x, gamma, beta, w, b):
    """x: (n_pixels, d1, d2).  gamma/beta/w: (n_pixels,), b: (1,).  Returns (d1, d2)."""
    n_pixels, d1, d2 = x.shape
    M = d1 * d2
    x2d = x.reshape(n_pixels, M)                      # free, row-major reshape

    # Fused parameters (tiny XLA reductions in the wrapper).
    gamma32 = gamma.astype(jnp.float32)
    beta32 = beta.astype(jnp.float32)
    w32 = w.astype(jnp.float32)
    gw = (gamma32 * w32).reshape(n_pixels, 1)
    s_gw = jnp.sum(gamma32 * w32)
    s_bw = jnp.sum(beta32 * w32) + b.astype(jnp.float32)[0]
    scalars = jnp.stack([s_gw, s_bw])                 # (2,) f32 -> SMEM

    # ---- tiling -------------------------------------------------------------
    LANE, SUB = 128, 8
    if M % LANE == 0 or M > 1024:
        M_pad = _round_up(M, LANE)
        TN = min(M_pad, 1024)
        while M_pad % TN:
            TN -= LANE
    else:
        # small / unaligned column count: one full-width block (allowed because
        # the block equals the full array dim), no column padding needed.
        M_pad, TN = M, M

    K_pad = _round_up(n_pixels, SUB)
    TK = min(K_pad, 512)
    while K_pad % TK:
        TK -= SUB

    # Zero padding is safe: padded rows/cols contribute 0 to every accumulated
    # sum and we divide by the true n_pixels; padded columns are sliced off.
    if (K_pad != n_pixels) or (M_pad != M):
        x2d = jnp.pad(x2d, ((0, K_pad - n_pixels), (0, M_pad - M)))
    if K_pad != n_pixels:
        gw = jnp.pad(gw, ((0, K_pad - n_pixels), (0, 0)))

    grid = (M_pad // TN, K_pad // TK)                 # (parallel cols, reduction)

    out_row = pl.pallas_call(
        functools.partial(_fwp_kernel, inv_n=1.0 / float(n_pixels)),
        out_shape=jax.ShapeDtypeStruct((1, M_pad), x.dtype),
        grid_spec=pltpu.PrefetchScalarGridSpec(
            num_scalar_prefetch=0,
            grid=grid,
            in_specs=[
                pl.BlockSpec((TK, TN), lambda j, k: (k, j)),
                pl.BlockSpec((TK, 1), lambda j, k: (k, 0)),
                pl.BlockSpec(memory_space=pltpu.MemorySpace.SMEM),
            ],
            out_specs=pl.BlockSpec((1, TN), lambda j, k: (0, j)),
            scratch_shapes=[
                pltpu.VMEM((1, TN), jnp.float32),
                pltpu.VMEM((1, TN), jnp.float32),
                pltpu.VMEM((1, TN), jnp.float32),
            ],
        ),
        compiler_params=pltpu.CompilerParams(
            dimension_semantics=("parallel", "arbitrary"),
        ),
    )(x2d, gw, scalars)

    # out_row[0, c] with c = i*d2 + j equals proj(x[:, i, j]) -> reshape is the
    # exact inverse of PyTorch's transpose/reshape/transpose dance.
    return out_row[0, :M].reshape(d1, d2)


def _reference(x, gamma, beta, w, b):
    xt = jnp.transpose(x, (2, 1, 0))                  # (d2, d1, n_pixels)
    mean = jnp.mean(xt, axis=-1, keepdims=True)
    var = jnp.mean((xt - mean) ** 2, axis=-1, keepdims=True)
    xn = (xt - mean) / jnp.sqrt(var + EPS)
    y = xn * gamma + beta
    proj = jnp.einsum("abn,n->ab", y, w) + b[0]       # (d2, d1)
    return jnp.transpose(proj, (1, 0))                # (d1, d2)


if __name__ == "__main__":
    # Small but non-trivial shapes: exercises the multi-step reduction axis
    # (K_pad=1008 -> 2 k-steps), zero row padding (1001 -> 1008) and an
    # unaligned lane dim handled as a full-width block (M = 8*18 = 144).
    n_pixels, d1, d2 = 1001, 8, 18

    key = jax.random.PRNGKey(0)
    kx, kg, kb, kw, kbias = jax.random.split(key, 5)

    x = jax.random.normal(kx, (n_pixels, d1, d2), dtype=jnp.float32)
    gamma = 1.0 + 0.1 * jax.random.normal(kg, (n_pixels,), dtype=jnp.float32)
    beta = 0.1 * jax.random.normal(kb, (n_pixels,), dtype=jnp.float32)
    w = jax.random.normal(kw, (n_pixels,), dtype=jnp.float32) / jnp.sqrt(n_pixels)
    b = 0.1 * jax.random.normal(kbias, (1,), dtype=jnp.float32)

    out = featurewise_projection(x, gamma, beta, w, b)
    out = jax.block_until_ready(out)

    ref = _reference(x, gamma, beta, w, b)
    assert out.shape == (d1, d2), out.shape
    assert jnp.allclose(out, ref, atol=5e-4, rtol=5e-4), "mismatch vs reference"

    print("KERNEL_OK")
</pallas_src>

<mosaic_0001>
module attributes {stable_mosaic.version = 11 : i64} {
  func.func @_fwp_kernel(%arg0: i32, %arg1: i32, %arg2: memref<504x144xf32, #tpu.memory_space<vmem>>, %arg3: memref<504x1xf32, #tpu.memory_space<vmem>>, %arg4: memref<2xf32, #tpu.memory_space<smem>>, %arg5: memref<1x144xf32, #tpu.memory_space<vmem>>, %arg6: memref<1x144xf32, #tpu.memory_space<vmem>>, %arg7: memref<1x144xf32, #tpu.memory_space<vmem>>, %arg8: memref<1x144xf32, #tpu.memory_space<vmem>>) attributes {dimension_semantics = [#tpu.dimension_semantics<parallel>, #tpu.dimension_semantics<arbitrary>], iteration_bounds = array<i64: 1, 2>, scalar_prefetch = 0 : i64, scratch_operands = 3 : i64, tpu.core_type = #tpu.core_type<tc>, window_params = [{transform_indices = @transform_0, window_bounds = array<i64: 504, 144>}, {transform_indices = @transform_1, window_bounds = array<i64: 504, 1>}, {transform_indices = @transform_2, window_bounds = array<i64: 2>}, {transform_indices = @transform_3, window_bounds = array<i64: 1, 144>}]} {
    %c0_i32 = arith.constant 0 : i32
    %0 = arith.cmpi eq, %arg1, %c0_i32 : i32
    %1 = arith.extui %0 : i1 to i32
    %c0_i32_0 = arith.constant 0 : i32
    %2 = arith.cmpi ne, %1, %c0_i32_0 : i32
    scf.if %2 {
      %cst_19 = arith.constant 0.000000e+00 : f32
      %26 = vector.broadcast %cst_19 : f32 to vector<1x144xf32>
      %c0_20 = arith.constant 0 : index
      %c0_21 = arith.constant 0 : index
      %27 = vector.load %arg6[%c0_20, %c0_21] : memref<1x144xf32, #tpu.memory_space<vmem>>, vector<1x144xf32>
      tpu.vector_store %arg6[%c0_20, %c0_21], %26 {strides = array<i32>} : memref<1x144xf32, #tpu.memory_space<vmem>>, vector<1x144xf32>,
      %cst_22 = arith.constant 0.000000e+00 : f32
      %28 = vector.broadcast %cst_22 : f32 to vector<1x144xf32>
      %c0_23 = arith.constant 0 : index
      %c0_24 = arith.constant 0 : index
      %29 = vector.load %arg7[%c0_23, %c0_24] : memref<1x144xf32, #tpu.memory_space<vmem>>, vector<1x144xf32>
      tpu.vector_store %arg7[%c0_23, %c0_24], %28 {strides = array<i32>} : memref<1x144xf32, #tpu.memory_space<vmem>>, vector<1x144xf32>,
      %cst_25 = arith.constant 0.000000e+00 : f32
      %30 = vector.broadcast %cst_25 : f32 to vector<1x144xf32>
      %c0_26 = arith.constant 0 : index
      %c0_27 = arith.constant 0 : index
      %31 = vector.load %arg8[%c0_26, %c0_27] : memref<1x144xf32, #tpu.memory_space<vmem>>, vector<1x144xf32>
      tpu.vector_store %arg8[%c0_26, %c0_27], %30 {strides = array<i32>} : memref<1x144xf32, #tpu.memory_space<vmem>>, vector<1x144xf32>,
    } else {
    }
    %c0 = arith.constant 0 : index
    %c0_1 = arith.constant 0 : index
    %3 = vector.load %arg2[%c0, %c0_1] : memref<504x144xf32, #tpu.memory_space<vmem>>, vector<504x144xf32>
    %c0_2 = arith.constant 0 : index
    %c0_3 = arith.constant 0 : index
    %4 = vector.load %arg3[%c0_2, %c0_3] : memref<504x1xf32, #tpu.memory_space<vmem>>, vector<504x1xf32>
    %c0_4 = arith.constant 0 : index
    %c0_5 = arith.constant 0 : index
    %5 = vector.load %arg6[%c0_4, %c0_5] : memref<1x144xf32, #tpu.memory_space<vmem>>, vector<1x144xf32>
    %cst = arith.constant dense<0.000000e+00> : vector<144xf32>
    %6 = vector.multi_reduction <add>, %3, %cst [0] : vector<504x144xf32> to vector<144xf32>
    %7 = vector.shape_cast %6 : vector<144xf32> to vector<1x144xf32>
    %8 = arith.addf %5, %7 : vector<1x144xf32>
    %c0_6 = arith.constant 0 : index
    %c0_7 = arith.constant 0 : index
    %9 = vector.load %arg6[%c0_6, %c0_7] : memref<1x144xf32, #tpu.memory_space<vmem>>, vector<1x144xf32>
    tpu.vector_store %arg6[%c0_6, %c0_7], %8 {strides = array<i32>} : memref<1x144xf32, #tpu.memory_space<vmem>>, vector<1x144xf32>,
    %c0_8 = arith.constant 0 : index
    %c0_9 = arith.constant 0 : index
    %10 = vector.load %arg7[%c0_8, %c0_9] : memref<1x144xf32, #tpu.memory_space<vmem>>, vector<1x144xf32>
    %11 = arith.mulf %3, %3 : vector<504x144xf32>
    %cst_10 = arith.constant dense<0.000000e+00> : vector<144xf32>
    %12 = vector.multi_reduction <add>, %11, %cst_10 [0] : vector<504x144xf32> to vector<144xf32>
    %13 = vector.shape_cast %12 : vector<144xf32> to vector<1x144xf32>
    %14 = arith.addf %10, %13 : vector<1x144xf32>
    %c0_11 = arith.constant 0 : index
    %c0_12 = arith.constant 0 : index
    %15 = vector.load %arg7[%c0_11, %c0_12] : memref<1x144xf32, #tpu.memory_space<vmem>>, vector<1x144xf32>
    tpu.vector_store %arg7[%c0_11, %c0_12], %14 {strides = array<i32>} : memref<1x144xf32, #tpu.memory_space<vmem>>, vector<1x144xf32>,
    %c0_13 = arith.constant 0 : index
    %c0_14 = arith.constant 0 : index
    %16 = vector.load %arg8[%c0_13, %c0_14] : memref<1x144xf32, #tpu.memory_space<vmem>>, vector<1x144xf32>
    %17 = vector.broadcast %4 : vector<504x1xf32> to vector<504x144xf32>
    %18 = arith.mulf %3, %17 : vector<504x144xf32>
    %cst_15 = arith.constant dense<0.000000e+00> : vector<144xf32>
    %19 = vector.multi_reduction <add>, %18, %cst_15 [0] : vector<504x144xf32> to vector<144xf32>
    %20 = vector.shape_cast %19 : vector<144xf32> to vector<1x144xf32>
    %21 = arith.addf %16, %20 : vector<1x144xf32>
    %c0_16 = arith.constant 0 : index
    %c0_17 = arith.constant 0 : index
    %22 = vector.load %arg8[%c0_16, %c0_17] : memref<1x144xf32, #tpu.memory_space<vmem>>, vector<1x144xf32>
    tpu.vector_store %arg8[%c0_16, %c0_17], %21 {strides = array<i32>} : memref<1x144xf32, #tpu.memory_space<vmem>>, vector<1x144xf32>,
    %c1_i32 = arith.constant 1 : i32
    %23 = arith.cmpi eq, %arg1, %c1_i32 : i32
    %24 = arith.extui %23 : i1 to i32
    %c0_i32_18 = arith.constant 0 : i32
    %25 = arith.cmpi ne, %24, %c0_i32_18 : i32
    scf.if %25 {
      %c0_19 = arith.constant 0 : index
      %c0_20 = arith.constant 0 : index
      %26 = vector.load %arg6[%c0_19, %c0_20] : memref<1x144xf32, #tpu.memory_space<vmem>>, vector<1x144xf32>
      %cst_21 = arith.constant 9.99000971E-4 : f32
      %27 = vector.broadcast %cst_21 : f32 to vector<1x144xf32>
      %28 = arith.mulf %26, %27 : vector<1x144xf32>
      %c0_22 = arith.constant 0 : index
      %c0_23 = arith.constant 0 : index
      %29 = vector.load %arg7[%c0_22, %c0_23] : memref<1x144xf32, #tpu.memory_space<vmem>>, vector<1x144xf32>
      %cst_24 = arith.constant 9.99000971E-4 : f32
      %30 = vector.broadcast %cst_24 : f32 to vector<1x144xf32>
      %31 = arith.mulf %29, %30 : vector<1x144xf32>
      %32 = arith.mulf %28, %28 : vector<1x144xf32>
      %33 = arith.subf %31, %32 : vector<1x144xf32>
      %cst_25 = arith.constant 9.99999974E-6 : f32
      %34 = vector.broadcast %cst_25 : f32 to vector<1x144xf32>
      %35 = arith.addf %33, %34 : vector<1x144xf32>
      %36 = math.rsqrt %35 : vector<1x144xf32>
      %c0_26 = arith.constant 0 : index
      %37 = memref.load %arg4[%c0_26] : memref<2xf32, #tpu.memory_space<smem>>
      %c1 = arith.constant 1 : index
      %38 = memref.load %arg4[%c1] : memref<2xf32, #tpu.memory_space<smem>>
      %c0_27 = arith.constant 0 : index
      %c0_28 = arith.constant 0 : index
      %39 = vector.load %arg8[%c0_27, %c0_28] : memref<1x144xf32, #tpu.memory_space<vmem>>, vector<1x144xf32>
      %40 = vector.broadcast %37 : f32 to vector<1x144xf32>
      %41 = arith.mulf %28, %40 : vector<1x144xf32>
      %42 = arith.subf %39, %41 : vector<1x144xf32>
      %43 = arith.mulf %36, %42 : vector<1x144xf32>
      %44 = vector.broadcast %38 : f32 to vector<1x144xf32>
      %45 = arith.addf %43, %44 : vector<1x144xf32>
      %c0_29 = arith.constant 0 : index
      %c0_30 = arith.constant 0 : index
      %46 = vector.load %arg5[%c0_29, %c0_30] : memref<1x144xf32, #tpu.memory_space<vmem>>, vector<1x144xf32>
      tpu.vector_store %arg5[%c0_29, %c0_30], %45 {strides = array<i32>} : memref<1x144xf32, #tpu.memory_space<vmem>>, vector<1x144xf32>,
    } else {
    }
    return
  }
  func.func @transform_0(%arg0: i32, %arg1: i32) -> (i32, i32) {
    %c0_i32 = arith.constant 0 : i32
    return %arg1, %arg0 : i32, i32
  }
  func.func @transform_1(%arg0: i32, %arg1: i32) -> (i32, i32) {
    %c0_i32 = arith.constant 0 : i32
    %c0_i32_0 = arith.constant 0 : i32
    return %arg1, %c0_i32 : i32, i32
  }
  func.func @transform_2(%arg0: i32, %arg1: i32) -> i32 {
    %c0_i32 = arith.constant 0 : i32
    %c0_i32_0 = arith.constant 0 : i32
    return %c0_i32 : i32
  }
  func.func @transform_3(%arg0: i32, %arg1: i32) -> (i32, i32) {
    %c0_i32 = arith.constant 0 : i32
    %c0_i32_0 = arith.constant 0 : i32
    return %c0_i32, %arg0 : i32, i32
  }
}

</mosaic_0001>

<bundles_post_ra>
// kernel: tpu_custom_call.1
= control target key start
LH: loop header
LB: loop body
LE: loop exit
PB: predicated region body
PF: predicated region fallthrough
CT: control target
= control target key end

     0   :  { %8 = vsyncpa [#allocation7], 0  ;;  %s2841_s0 = inlined_call_operand.vmem [shape: f32[1008,144], index: 0, kind: input, shape index: {}]   ;;  %s2842_s1 = inlined_call_operand.vmem [shape: f32[1008,1], index: 1, kind: input, shape index: {}]   ;;  %s2843_s2 = inlined_call_operand.vmem [shape: f32[2], index: 2, kind: input, shape index: {}]   ;;  %s2844_s3 = inlined_call_operand.hbm [shape: f32[1,144], index: 3, kind: output, shape index: {}]  }
   0x1   :  { %9 = vsyncpa [#allocation6], 0  ;;  %s2031_s12 = smov 0   ;;  %s2033_s13 = smov 0  }
   0x2   :  { %s2035_s14 = smov 0  }
   0x3 LB: > { %s1776_s15 = sadd.s32 4294967295, %s2004_s14   ;;  %s24_s16 = sadd.s32 1, %s2000_s13  ;;  %s2004_s14 = sphi %s2035_s14, %s15_s14   ;;  %s2000_s13 = sphi %s2033_s13, %s2859_s13   ;;  %s1996_s12 = sphi %s2031_s12, %s2858_s12  }
   0x4   : > { %p25_p0 = scmp.ge.s32.totalorder %s24_s16, 2  ;;  %p1777_p1 = scmp.ge.s32.totalorder %s2004_s14, 1 }
   0x5   : > { %p133_p2 = scmp.lt.s32.totalorder %s2004_s14, 3  ;;  %p2058_p4 = scmp.eq.s32.totalorder %s1776_s15, 0 }
   0x6   : > { %s2861_s16 = smov (%p25_p0, %s24_s16), 0  ;;  %s146_s21 = sshll.u32 %s2843_s2, 4  ;;  %s147_s21 = int_to_ptr.vmem [resolvable:$true] %s146_s21 }
   0x7   : > { %p2052_p3 = pnand %p1777_p1, %p133_p2  ;;  %s1935_s22 = scalar_lea.vmem %s147_s21, 16 }
   0x8   : > { %p1936_p7 = scmp.ne.s32.totalorder %s147_s21, %s1935_s22  ;;  %p1943_p11 = scmp.lt.s32.totalorder %s147_s21, %s147_s21 }
   0x9   : > { %p1801_p5 = pneg %p2052_p3  ;;  %p1944_p12 = scmp.lt.s32.totalorder %s1935_s22, %s1935_s22 }
   0xb   : > { %p1802_p6 = pnand %p2058_p4, %p1801_p5  ;;  %p1945_p13 = por %p1944_p12, %p1943_p11 }
   0xd   : > { %p1937_p8 = pneg %p1802_p6 }
   0xf   : > { %p1938_p9 = pnand %p1937_p8, %p1936_p7 }
  0x11   : > { %p1939_p10 = pneg %p1938_p9 }
  0x13   : > { %p1946_p0 = pnand %p1945_p13, %p1939_p10 }
  0x15   : > { %1949 = shalt.err (!%p1946_p0)
}
  0x16   : > { %s2006_s23 = smov [#allocation5]   ;;  %183 = sbr.rel (%p2052_p3) target bundleno = 363 (0x16b), region = 32 }
  0x17   : > { %1804 = dma.vmem_to_smem (!%p1802_p6), %s147_s21, 16, %s2006_s23, [#allocation7]  }
  0x1b   : > { %1987 = dma.done.wait (%p2058_p4), [#allocation7], 16  }
  0x1c   : > { %1989 = vsyncadd (%p2058_p4), [#allocation7], 4294967280 }
  0x1d   : > { %189 = sfence }
  0x1e   : > { %s213_s24 = smul.u32 63, %s1996_s12  ;;  %p1785_p2 = scmp.ne.s32.totalorder %s1996_s12, 0 }
  0x20   : > { %p215_p1 = scmp.lt.s32.totalorder %s213_s24, 125  ;;  %235 = sbr.rel (%p1785_p2) target bundleno = 42 (0x2a), region = 40 }
  0x22   : > { %s2863_s24 = smov (!%p215_p1, %s213_s24), 125 }
  0x23   : > { %s1792_s25 = sshll.u32 %s2863_s24, 4  ;;  %s1784_s26 = sshll.u32 %s2863_s24, 3 }
  0x24   : > { %s2079_s29 = scalar_lea.vmem %s2841_s0, %s1792_s25  ;;  %s2084_s5 = scalar_lea.vmem %s2842_s1, %s1784_s26 }
  0x25   : > { %v236_v0 = vlaneseq  ;;  %v2007_v1 = vmov 0.0  }
  0x27   : > { %vm238_vm0 = vcmp.lt.s32.totalorder %v236_v0, 144 }
  0x28   : > { %240 = vst.msk [vmem:[#allocation2] sm:$0x3] %vm238_vm0, %v2007_v1  ;;  %241 = vst.msk [vmem:[#allocation3] sm:$0x3] %vm238_vm0, %v2007_v1 }
  0x29   : > { %242 = vst.msk [vmem:[#allocation4] sm:$0x3] %vm238_vm0, %v2007_v1 }
  0x2a PF: > { %v371_v2 = vld [vmem:[%s2084_s5 + $0x10] sm:$0xff]  ;;  %v369_v3 = vld [vmem:[%s2084_s5] sm:$0xff]  ;;  %v2008_v4 = vmov 0   ;;  %v372_v5 = vld [vmem:[%s2084_s5 + $0x18] sm:$0xff]  ;;  %vm501_vm1 = vcmask 130048   ;;  %p1786_p3 = scmp.ne.s32.totalorder %s1996_s12, 1 }
  0x2b   : > { %1839 = vset.pattern.permute.xlu1 %v2008_v4  ;;  %1838 = vset.pattern.permute.xlu0 %v2008_v4  ;;  %v370_v6 = vld [vmem:[%s2084_s5 + $0x8] sm:$0xff]  ;;  %v373_v8 = vld [vmem:[%s2084_s5 + $0x20] sm:$0xff]  ;;  %v376_v9 = vld [vmem:[%s2084_s5 + $0x38] sm:$0xff]  ;;  %s1676_s6 = sld [smem:[#allocation5]] (!%p1786_p3) }
  0x2c   : > { %1016 = vperm.xlu1 %1839, %v371_v2   ;;  %1006 = vperm.xlu0 %1838, %v369_v3   ;;  %v374_v7 = vld [vmem:[%s2084_s5 + $0x28] sm:$0xff]  ;;  %v375_v10 = vld [vmem:[%s2084_s5 + $0x30] sm:$0xff]  ;;  %v377_v12 = vld [vmem:[%s2084_s5 + $0x40] sm:$0xff]  ;;  %s1787_s7 = sld [smem:[#allocation5 + $0x1]] (!%p1786_p3) }
  0x2d   : > { %v378_v11 = vld [vmem:[%s2084_s5 + $0x48] sm:$0xff]  ;;  %v380_v13 = vld [vmem:[%s2084_s5 + $0x58] sm:$0xff]  ;;  %v379_v14 = vld [vmem:[%s2084_s5 + $0x50] sm:$0xff] }
  0x2e   : > { %v248_v15 = vld [vmem:[%s2079_s29 + $0x28] sm:$0xff]  ;;  %v243_v16 = vld [vmem:[%s2079_s29] sm:$0xff]  ;;  %v250_v23 = vld [vmem:[%s2079_s29 + $0x38] sm:$0xff] }
  0x2f   : > { %v244_v17 = vld [vmem:[%s2079_s29 + $0x8] sm:$0xff]  ;;  %v247_v19 = vld [vmem:[%s2079_s29 + $0x20] sm:$0xff]  ;;  %v663_v20 = vmul.f32 %v248_v15, %v248_v15  ;;  %v658_v22 = vmul.f32 %v243_v16, %v243_v16  ;;  %v665_v27 = vmul.f32 %v250_v23, %v250_v23  ;;  %v245_v28 = vld [vmem:[%s2079_s29 + $0x10] sm:$0xff]  ;;  %v505_v30 = vsel %vm501_vm1, %v248_v15, 0.0 }
  0x30   : > { %1021 = vperm.xlu1 %1839, %v372_v5   ;;  %1011 = vperm.xlu0 %1838, %v370_v6   ;;  %v382_v18 = vld [vmem:[%s2084_s5 + $0x68] sm:$0xff]  ;;  %v502_v21 = vsel %vm501_vm1, %v244_v17, 0.0  ;;  %v381_v24 = vld [vmem:[%s2084_s5 + $0x60] sm:$0xff]  ;;  %v662_v25 = vmul.f32 %v247_v19, %v247_v19  ;;  %v659_v26 = vmul.f32 %v244_v17, %v244_v17  ;;  %v246_v29 = vld [vmem:[%s2079_s29 + $0x18] sm:$0xff]  ;;  %v433_v31 = vadd.f32 %v245_v28, %v243_v16 }
  0x31   : > { %v503_v32 = vsel %vm501_vm1, %v246_v29, 0.0  ;;  %v660_v33 = vmul.f32 %v245_v28, %v245_v28  ;;  %v249_v35 = vld [vmem:[%s2079_s29 + $0x30] sm:$0xff]  ;;  %v507_v36 = vsel %vm501_vm1, %v250_v23, 0.0  ;;  %v661_v38 = vmul.f32 %v246_v29, %v246_v29  ;;  %v252_v43 = vld [vmem:[%s2079_s29 + $0x48] sm:$0xff]  ;;  %v384_v44 = vld [vmem:[%s2084_s5 + $0x78] sm:$0xff] }
  0x32   : > { %v852_v34 = vsel %vm501_vm1, %v659_v26, 0.0  ;;  %v504_v37 = vadd.f32 %v503_v32, %v502_v21  ;;  %v855_v39 = vsel %vm501_vm1, %v663_v20, 0.0  ;;  %v664_v40 = vmul.f32 %v249_v35, %v249_v35  ;;  %v383_v45 = vld [vmem:[%s2084_s5 + $0x70] sm:$0xff]  ;;  %v251_v49 = vld [vmem:[%s2079_s29 + $0x40] sm:$0xff]  ;;  %v254_v55 = vld [vmem:[%s2079_s29 + $0x58] sm:$0xff] }
  0x33   : > { %v434_v41 = vadd.f32 %v433_v31, %v247_v19  ;;  %v784_v42 = vadd.f32 %v660_v33, %v658_v22  ;;  %v857_v46 = vsel %vm501_vm1, %v665_v27, 0.0  ;;  %v853_v48 = vsel %vm501_vm1, %v661_v38, 0.0  ;;  %v253_v54 = vld [vmem:[%s2079_s29 + $0x50] sm:$0xff]  ;;  %v258_v1 = vld [vmem:[%s2079_s29 + $0x78] sm:$0xff]  ;;  %v256_v2 = vld [vmem:[%s2079_s29 + $0x68] sm:$0xff] }
  0x34   : > { %1031 = vperm.xlu1 %1839, %v374_v7   ;;  %1026 = vperm.xlu0 %1838, %v373_v8   ;;  %v506_v47 = vadd.f32 %v505_v30, %v504_v37  ;;  %v509_v50 = vsel %vm501_vm1, %v252_v43, 0.0  ;;  %v854_v53 = vadd.f32 %v853_v48, %v852_v34  ;;  %v666_v56 = vmul.f32 %v251_v49, %v251_v49  ;;  %v386_v3 = vld [vmem:[%s2084_s5 + $0x88] sm:$0xff]  ;;  %v385_v4 = vld [vmem:[%s2084_s5 + $0x80] sm:$0xff]  ;;  %v261_v33 = vld [vmem:[%s2079_s29 + $0x90] sm:$0xff] }
  0x35   : > { %v435_v51 = vadd.f32 %v434_v41, %v249_v35  ;;  %v785_v52 = vadd.f32 %v784_v42, %v662_v25  ;;  %v668_v58 = vmul.f32 %v253_v54, %v253_v54  ;;  %v669_v59 = vmul.f32 %v254_v55, %v254_v55  ;;  %v255_v8 = vld [vmem:[%s2079_s29 + $0x60] sm:$0xff]  ;;  %v260_v23 = vld [vmem:[%s2079_s29 + $0x88] sm:$0xff]  ;;  %v387_v25 = vld [vmem:[%s2084_s5 + $0x90] sm:$0xff] }
  0x36   : > { %v508_v57 = vadd.f32 %v507_v36, %v506_v47  ;;  %v667_v60 = vmul.f32 %v252_v43, %v252_v43  ;;  %v856_v62 = vadd.f32 %v855_v39, %v854_v53  ;;  %v511_v63 = vsel %vm501_vm1, %v254_v55, 0.0  ;;  %v259_v29 = vld [vmem:[%s2079_s29 + $0x80] sm:$0xff]  ;;  %v262_v34 = vld [vmem:[%s2079_s29 + $0x98] sm:$0xff]  ;;  %v390_v47 = vld [vmem:[%s2084_s5 + $0xa8] sm:$0xff] }
  0x37   : > { %v786_v61 = vadd.f32 %v785_v52, %v664_v40  ;;  %v436_v0 = vadd.f32 %v435_v51, %v251_v49  ;;  %v673_v7 = vmul.f32 %v258_v1, %v258_v1  ;;  %v861_v15 = vsel %vm501_vm1, %v669_v59, 0.0  ;;  %v389_v48 = vld [vmem:[%s2084_s5 + $0xa0] sm:$0xff] }
  0x38   : > { %1041 = vperm.xlu1 %1839, %v376_v9   ;;  %1036 = vperm.xlu0 %1838, %v375_v10   ;;  %v510_v5 = vadd.f32 %v509_v50, %v508_v57  ;;  %v859_v6 = vsel %vm501_vm1, %v667_v60, 0.0  ;;  %v513_v9 = vsel %vm501_vm1, %v256_v2, 0.0  ;;  %v858_v10 = vadd.f32 %v857_v46, %v856_v62  ;;  %v264_v46 = vld [vmem:[%s2079_s29 + $0xa8] sm:$0xff]  ;;  %v263_v52 = vld [vmem:[%s2079_s29 + $0xa0] sm:$0xff] }
  0x39   : > { %v515_v20 = vsel %vm501_vm1, %v258_v1, 0.0  ;;  %v865_v26 = vsel %vm501_vm1, %v673_v7, 0.0  ;;  %v517_v30 = vsel %vm501_vm1, %v260_v23, 0.0  ;;  %v674_v36 = vmul.f32 %v259_v29, %v259_v29 }
  0x3a   : > { %v512_v17 = vadd.f32 %v511_v63, %v510_v5  ;;  %v860_v19 = vadd.f32 %v859_v6, %v858_v10  ;;  %v676_v37 = vmul.f32 %v261_v33, %v261_v33  ;;  %v677_v38 = vmul.f32 %v262_v34, %v262_v34  ;;  %v391_v5 = vld [vmem:[%s2084_s5 + $0xb0] sm:$0xff] }
  0x3b   : > { %v675_v40 = vmul.f32 %v260_v23, %v260_v23  ;;  %v519_v42 = vsel %vm501_vm1, %v262_v34, 0.0  ;;  %v521_v53 = vsel %vm501_vm1, %v264_v46, 0.0  ;;  %v679_v62 = vmul.f32 %v264_v46, %v264_v46 }
  0x3c   : > { %1051 = vperm.xlu1 %1839, %v378_v11   ;;  %1046 = vperm.xlu0 %1838, %v377_v12   ;;  %v787_v11 = vadd.f32 %v786_v61, %v666_v56  ;;  %v257_v12 = vld [vmem:[%s2079_s29 + $0x70] sm:$0xff]  ;;  %v514_v27 = vadd.f32 %v513_v9, %v512_v17  ;;  %v862_v32 = vadd.f32 %v861_v15, %v860_v19  ;;  %v869_v59 = vsel %vm501_vm1, %v677_v38, 0.0  ;;  %v267_v9 = vld [vmem:[%s2079_s29 + $0xc0] sm:$0xff] }
  0x3d   : > { %v672_v16 = vmul.f32 %v257_v12, %v257_v12  ;;  %v867_v50 = vsel %vm501_vm1, %v675_v40, 0.0  ;;  %v265_v56 = vld [vmem:[%s2079_s29 + $0xb0] sm:$0xff] }
  0x3e   : > { %v788_v22 = vadd.f32 %v787_v11, %v668_v58  ;;  %v516_v39 = vadd.f32 %v515_v20, %v514_v27  ;;  %v678_v58 = vmul.f32 %v263_v52, %v263_v52  ;;  %v680_v60 = vmul.f32 %v265_v56, %v265_v56  ;;  %v394_v27 = vld [vmem:[%s2084_s5 + $0xc8] sm:$0xff] }
  0x40   : > { %1061 = vperm.xlu1 %1839, %v380_v13   ;;  %1056 = vperm.xlu0 %1838, %v379_v14   ;;  %v437_v13 = vadd.f32 %v436_v0, %v253_v54  ;;  %v670_v14 = vmul.f32 %v255_v8, %v255_v8  ;;  %v518_v49 = vadd.f32 %v517_v30, %v516_v39 }
  0x42   : > { %v438_v21 = vadd.f32 %v437_v13, %v255_v8  ;;  %v789_v31 = vadd.f32 %v788_v22, %v670_v14  ;;  %v520_v61 = vadd.f32 %v519_v42, %v518_v49  ;;  %v871_v8 = vsel %vm501_vm1, %v679_v62, 0.0  ;;  %v269_v13 = vld [vmem:[%s2079_s29 + $0xd0] sm:$0xff]  ;;  %v270_v14 = vld [vmem:[%s2079_s29 + $0xd8] sm:$0xff] }
  0x43   : > { %v684_v17 = vmul.f32 %v269_v13, %v269_v13  ;;  %v527_v22 = vsel %vm501_vm1, %v270_v14, 0.0  ;;  %v395_v49 = vld [vmem:[%s2084_s5 + $0xd0] sm:$0xff] }
  0x44   : > { %1071 = vperm.xlu1 %1839, %v382_v18   ;;  %1066 = vperm.xlu0 %1838, %v381_v24   ;;  %v671_v18 = vmul.f32 %v256_v2, %v256_v2  ;;  %v388_v24 = vld [vmem:[%s2084_s5 + $0x98] sm:$0xff]  ;;  %v439_v35 = vadd.f32 %v438_v21, %v257_v12  ;;  %v522_v7 = vadd.f32 %v521_v53, %v520_v61  ;;  %v275_v53 = vld [vmem:[%s2079_s29 + $0x100] sm:$0xff] }
  0x46   : > { %v863_v28 = vsel %vm501_vm1, %v671_v18, 0.0  ;;  %v440_v43 = vadd.f32 %v439_v35, %v259_v29  ;;  %v685_v18 = vmul.f32 %v270_v14, %v270_v14 }
  0x47   : > { %v864_v41 = vadd.f32 %v863_v28, %v862_v32  ;;  %v393_v28 = vld [vmem:[%s2084_s5 + $0xc0] sm:$0xff] }
  0x48   : > { %1081 = vperm.xlu1 %1839, %v384_v44   ;;  %1076 = vperm.xlu0 %1838, %v383_v45   ;;  %v790_v44 = vadd.f32 %v789_v31, %v672_v16  ;;  %v266_v45 = vld [vmem:[%s2079_s29 + $0xb8] sm:$0xff]  ;;  %v441_v57 = vadd.f32 %v440_v43, %v261_v33  ;;  %v682_v16 = vmul.f32 %v267_v9, %v267_v9  ;;  %v271_v32 = vld [vmem:[%s2079_s29 + $0xe0] sm:$0xff]  ;;  %v877_v39 = vsel %vm501_vm1, %v685_v18, 0.0 }
  0x49   : > { %v681_v51 = vmul.f32 %v266_v45, %v266_v45  ;;  %v866_v55 = vadd.f32 %v865_v26, %v864_v41  ;;  %v523_v0 = vsel %vm501_vm1, %v266_v45, 0.0  ;;  %v272_v26 = vld [vmem:[%s2079_s29 + $0xe8] sm:$0xff]  ;;  %v686_v38 = vmul.f32 %v271_v32, %v271_v32 }
  0x4a   : > { %v791_v54 = vadd.f32 %v790_v44, %v674_v36  ;;  %v442_v1 = vadd.f32 %v441_v57, %v263_v52  ;;  %v524_v19 = vadd.f32 %v523_v0, %v522_v7  ;;  %v529_v33 = vsel %vm501_vm1, %v272_v26, 0.0  ;;  %v273_v36 = vld [vmem:[%s2079_s29 + $0xf0] sm:$0xff]  ;;  %v398_v7 = vld [vmem:[%s2084_s5 + $0xe8] sm:$0xff] }
  0x4b   : > { %v868_v63 = vadd.f32 %v867_v50, %v866_v55  ;;  %v873_v6 = vsel %vm501_vm1, %v681_v51, 0.0  ;;  %v688_v40 = vmul.f32 %v273_v36, %v273_v36  ;;  %v687_v42 = vmul.f32 %v272_v26, %v272_v26  ;;  %v277_v57 = vld [vmem:[%s2079_s29 + $0x110] sm:$0xff] }
  0x4c   : > { %1091 = vperm.xlu1 %1839, %v386_v3   ;;  %1086 = vperm.xlu0 %1838, %v385_v4   ;;  %v792_v2 = vadd.f32 %v791_v54, %v676_v37  ;;  %v268_v3 = vld [vmem:[%s2079_s29 + $0xc8] sm:$0xff]  ;;  %v392_v4 = vld [vmem:[%s2084_s5 + $0xb8] sm:$0xff]  ;;  %v443_v15 = vadd.f32 %v442_v1, %v265_v56  ;;  %v692_v61 = vmul.f32 %v277_v57, %v277_v57 }
  0x4d   : > { %v525_v10 = vsel %vm501_vm1, %v268_v3, 0.0  ;;  %v870_v12 = vadd.f32 %v869_v59, %v868_v63  ;;  %v683_v20 = vmul.f32 %v268_v3, %v268_v3  ;;  %v879_v52 = vsel %vm501_vm1, %v687_v42, 0.0 }
  0x4e   : > { %v793_v11 = vadd.f32 %v792_v2, %v678_v58  ;;  %v444_v23 = vadd.f32 %v443_v15, %v267_v9  ;;  %v526_v29 = vadd.f32 %v525_v10, %v524_v19  ;;  %v278_v58 = vld [vmem:[%s2079_s29 + $0x118] sm:$0xff] }
  0x4f   : > { %v872_v21 = vadd.f32 %v871_v8, %v870_v12  ;;  %v875_v30 = vsel %vm501_vm1, %v683_v20, 0.0  ;;  %v693_v62 = vmul.f32 %v278_v58, %v278_v58  ;;  %v535_v2 = vsel %vm501_vm1, %v278_v58, 0.0  ;;  %v397_v8 = vld [vmem:[%s2084_s5 + $0xe0] sm:$0xff] }
  0x50   : > { %1101 = vperm.xlu1 %1839, %v388_v24   ;;  %1096 = vperm.xlu0 %1838, %v387_v25   ;;  %v794_v24 = vadd.f32 %v793_v11, %v680_v60  ;;  %v274_v25 = vld [vmem:[%s2079_s29 + $0xf8] sm:$0xff]  ;;  %v445_v37 = vadd.f32 %v444_v23, %v269_v13  ;;  %v528_v41 = vadd.f32 %v527_v22, %v526_v29  ;;  %v279_v12 = vld [vmem:[%s2079_s29 + $0x120] sm:$0xff]  ;;  %v399_v29 = vld [vmem:[%s2084_s5 + $0xf0] sm:$0xff] }
  0x51   : > { %v689_v31 = vmul.f32 %v274_v25, %v274_v25  ;;  %v874_v35 = vadd.f32 %v873_v6, %v872_v21  ;;  %v531_v44 = vsel %vm501_vm1, %v274_v25, 0.0  ;;  %v690_v60 = vmul.f32 %v275_v53, %v275_v53  ;;  %v280_v6 = vld [vmem:[%s2079_s29 + $0x128] sm:$0xff] }
  0x52   : > { %v795_v34 = vadd.f32 %v794_v24, %v682_v16  ;;  %v446_v45 = vadd.f32 %v445_v37, %v271_v32  ;;  %v530_v51 = vadd.f32 %v529_v33, %v528_v41  ;;  %v537_v13 = vsel %vm501_vm1, %v280_v6, 0.0  ;;  %v281_v16 = vld [vmem:[%s2079_s29 + $0x130] sm:$0xff]  ;;  %v283_v33 = vld [vmem:[%s2079_s29 + $0x140] sm:$0xff] }
  0x53   : > { %v876_v43 = vadd.f32 %v875_v30, %v874_v35  ;;  %v881_v50 = vsel %vm501_vm1, %v689_v31, 0.0  ;;  %v694_v18 = vmul.f32 %v279_v12, %v279_v12  ;;  %v885_v19 = vsel %vm501_vm1, %v693_v62, 0.0  ;;  %v285_v37 = vld [vmem:[%s2079_s29 + $0x150] sm:$0xff] }
  0x54   : > { %1111 = vperm.xlu1 %1839, %v390_v47   ;;  %1106 = vperm.xlu0 %1838, %v389_v48   ;;  %v796_v46 = vadd.f32 %v795_v34, %v684_v17  ;;  %v276_v47 = vld [vmem:[%s2079_s29 + $0x108] sm:$0xff]  ;;  %v396_v48 = vld [vmem:[%s2084_s5 + $0xd8] sm:$0xff]  ;;  %v447_v59 = vadd.f32 %v446_v45, %v273_v36  ;;  %v532_v63 = vadd.f32 %v531_v44, %v530_v51 }
  0x55   : > { %v533_v54 = vsel %vm501_vm1, %v276_v47, 0.0  ;;  %v878_v56 = vadd.f32 %v877_v39, %v876_v43  ;;  %v691_v0 = vmul.f32 %v276_v47, %v276_v47  ;;  %v696_v20 = vmul.f32 %v281_v16, %v281_v16  ;;  %v402_v51 = vld [vmem:[%s2084_s5 + $0x108] sm:$0xff] }
  0x56   : > { %v797_v55 = vadd.f32 %v796_v46, %v686_v38  ;;  %v448_v3 = vadd.f32 %v447_v59, %v275_v53  ;;  %v534_v9 = vadd.f32 %v533_v54, %v532_v63  ;;  %v695_v22 = vmul.f32 %v280_v6, %v280_v6  ;;  %v286_v38 = vld [vmem:[%s2079_s29 + $0x158] sm:$0xff] }
  0x57   : > { %v880_v1 = vadd.f32 %v879_v52, %v878_v56  ;;  %v883_v10 = vsel %vm501_vm1, %v691_v0, 0.0  ;;  %v700_v41 = vmul.f32 %v285_v37, %v285_v37  ;;  %v701_v42 = vmul.f32 %v286_v38, %v286_v38  ;;  %v401_v52 = vld [vmem:[%s2084_s5 + $0x100] sm:$0xff] }
  0x58   : > { %1121 = vperm.xlu1 %1839, %v392_v4   ;;  %1116 = vperm.xlu0 %1838, %v391_v5   ;;  %v798_v4 = vadd.f32 %v797_v55, %v688_v40  ;;  %v282_v5 = vld [vmem:[%s2079_s29 + $0x138] sm:$0xff]  ;;  %v449_v17 = vadd.f32 %v448_v3, %v277_v57  ;;  %v536_v21 = vadd.f32 %v535_v2, %v534_v9  ;;  %v887_v32 = vsel %vm501_vm1, %v695_v22, 0.0  ;;  %v287_v56 = vld [vmem:[%s2079_s29 + $0x160] sm:$0xff]  ;;  %v403_v9 = vld [vmem:[%s2084_s5 + $0x110] sm:$0xff] }
  0x59   : > { %v697_v11 = vmul.f32 %v282_v5, %v282_v5  ;;  %v882_v15 = vadd.f32 %v881_v50, %v880_v1  ;;  %v539_v24 = vsel %vm501_vm1, %v282_v5, 0.0  ;;  %v698_v40 = vmul.f32 %v283_v33, %v283_v33  ;;  %v288_v50 = vld [vmem:[%s2079_s29 + $0x168] sm:$0xff] }
  0x5a   : > { %v799_v14 = vadd.f32 %v798_v4, %v690_v60  ;;  %v450_v25 = vadd.f32 %v449_v17, %v279_v12  ;;  %v538_v31 = vadd.f32 %v537_v13, %v536_v21  ;;  %v543_v46 = vsel %vm501_vm1, %v286_v38, 0.0  ;;  %v289_v60 = vld [vmem:[%s2079_s29 + $0x170] sm:$0xff]  ;;  %v291_v13 = vld [vmem:[%s2079_s29 + $0x180] sm:$0xff] }
  0x5b   : > { %v884_v23 = vadd.f32 %v883_v10, %v882_v15  ;;  %v889_v30 = vsel %vm501_vm1, %v697_v11, 0.0  ;;  %v545_v57 = vsel %vm501_vm1, %v288_v50, 0.0  ;;  %v702_v62 = vmul.f32 %v287_v56, %v287_v56  ;;  %v293_v17 = vld [vmem:[%s2079_s29 + $0x190] sm:$0xff] }
  0x5c   : > { %1131 = vperm.xlu1 %1839, %v394_v27   ;;  %1126 = vperm.xlu0 %1838, %v393_v28   ;;  %v800_v26 = vadd.f32 %v799_v14, %v692_v61  ;;  %v284_v27 = vld [vmem:[%s2079_s29 + $0x148] sm:$0xff]  ;;  %v400_v28 = vld [vmem:[%s2084_s5 + $0xf8] sm:$0xff]  ;;  %v451_v39 = vadd.f32 %v450_v25, %v281_v16  ;;  %v540_v43 = vadd.f32 %v539_v24, %v538_v31  ;;  %v893_v63 = vsel %vm501_vm1, %v701_v42, 0.0 }
  0x5d   : > { %v541_v34 = vsel %vm501_vm1, %v284_v27, 0.0  ;;  %v886_v36 = vadd.f32 %v885_v19, %v884_v23  ;;  %v699_v44 = vmul.f32 %v284_v27, %v284_v27  ;;  %v704_v0 = vmul.f32 %v289_v60, %v289_v60  ;;  %v406_v31 = vld [vmem:[%s2084_s5 + $0x128] sm:$0xff] }
  0x5e   : > { %v801_v35 = vadd.f32 %v800_v26, %v694_v18  ;;  %v452_v47 = vadd.f32 %v451_v39, %v283_v33  ;;  %v542_v53 = vadd.f32 %v541_v34, %v540_v43  ;;  %v703_v2 = vmul.f32 %v288_v50, %v288_v50  ;;  %v294_v18 = vld [vmem:[%s2079_s29 + $0x198] sm:$0xff] }
  0x5f   : > { %v888_v45 = vadd.f32 %v887_v32, %v886_v36  ;;  %v891_v54 = vsel %vm501_vm1, %v699_v44, 0.0  ;;  %v708_v21 = vmul.f32 %v293_v17, %v293_v17  ;;  %v709_v22 = vmul.f32 %v294_v18, %v294_v18  ;;  %v405_v32 = vld [vmem:[%s2084_s5 + $0x120] sm:$0xff] }
  0x60   : > { %1141 = vperm.xlu1 %1839, %v396_v48   ;;  %1136 = vperm.xlu0 %1838, %v395_v49   ;;  %v802_v48 = vadd.f32 %v801_v35, %v696_v20  ;;  %v290_v49 = vld [vmem:[%s2079_s29 + $0x178] sm:$0xff]  ;;  %v453_v61 = vadd.f32 %v452_v47, %v285_v37  ;;  %v544_v1 = vadd.f32 %v543_v46, %v542_v53  ;;  %v895_v12 = vsel %vm501_vm1, %v703_v2, 0.0  ;;  %v295_v36 = vld [vmem:[%s2079_s29 + $0x1a0] sm:$0xff]  ;;  %v407_v53 = vld [vmem:[%s2084_s5 + $0x130] sm:$0xff] }
  0x61   : > { %v705_v55 = vmul.f32 %v290_v49, %v290_v49  ;;  %v890_v59 = vadd.f32 %v889_v30, %v888_v45  ;;  %v547_v4 = vsel %vm501_vm1, %v290_v49, 0.0  ;;  %v706_v20 = vmul.f32 %v291_v13, %v291_v13  ;;  %v296_v30 = vld [vmem:[%s2079_s29 + $0x1a8] sm:$0xff] }
  0x62   : > { %v803_v58 = vadd.f32 %v802_v48, %v698_v40  ;;  %v454_v5 = vadd.f32 %v453_v61, %v287_v56  ;;  %v546_v11 = vadd.f32 %v545_v57, %v544_v1  ;;  %v551_v26 = vsel %vm501_vm1, %v294_v18, 0.0  ;;  %v297_v40 = vld [vmem:[%s2079_s29 + $0x1b0] sm:$0xff]  ;;  %v299_v57 = vld [vmem:[%s2079_s29 + $0x1c0] sm:$0xff] }
  0x63   : > { %v892_v3 = vadd.f32 %v891_v54, %v890_v59  ;;  %v897_v10 = vsel %vm501_vm1, %v705_v55, 0.0  ;;  %v553_v37 = vsel %vm501_vm1, %v296_v30, 0.0  ;;  %v710_v42 = vmul.f32 %v295_v36, %v295_v36  ;;  %v301_v61 = vld [vmem:[%s2079_s29 + $0x1d0] sm:$0xff] }
  0x64   : > { %1151 = vperm.xlu1 %1839, %v398_v7   ;;  %1146 = vperm.xlu0 %1838, %v397_v8   ;;  %v804_v6 = vadd.f32 %v803_v58, %v700_v41  ;;  %v292_v7 = vld [vmem:[%s2079_s29 + $0x188] sm:$0xff]  ;;  %v404_v8 = vld [vmem:[%s2084_s5 + $0x118] sm:$0xff]  ;;  %v455_v19 = vadd.f32 %v454_v5, %v289_v60  ;;  %v548_v23 = vadd.f32 %v547_v4, %v546_v11  ;;  %v901_v43 = vsel %vm501_vm1, %v709_v22, 0.0 }
  0x65   : > { %v549_v14 = vsel %vm501_vm1, %v292_v7, 0.0  ;;  %v894_v16 = vadd.f32 %v893_v63, %v892_v3  ;;  %v707_v24 = vmul.f32 %v292_v7, %v292_v7  ;;  %v712_v44 = vmul.f32 %v297_v40, %v297_v40  ;;  %v410_v11 = vld [vmem:[%s2084_s5 + $0x148] sm:$0xff] }
  0x66   : > { %v805_v15 = vadd.f32 %v804_v6, %v702_v62  ;;  %v456_v27 = vadd.f32 %v455_v19, %v291_v13  ;;  %v550_v33 = vadd.f32 %v549_v14, %v548_v23  ;;  %v711_v46 = vmul.f32 %v296_v30, %v296_v30  ;;  %v302_v62 = vld [vmem:[%s2079_s29 + $0x1d8] sm:$0xff] }
  0x67   : > { %v896_v25 = vadd.f32 %v895_v12, %v894_v16  ;;  %v899_v34 = vsel %vm501_vm1, %v707_v24, 0.0  ;;  %v716_v1 = vmul.f32 %v301_v61, %v301_v61  ;;  %v717_v2 = vmul.f32 %v302_v62, %v302_v62  ;;  %v409_v12 = vld [vmem:[%s2084_s5 + $0x140] sm:$0xff] }
  0x68   : > { %1161 = vperm.xlu1 %1839, %v400_v28   ;;  %1156 = vperm.xlu0 %1838, %v399_v29   ;;  %v806_v28 = vadd.f32 %v805_v15, %v704_v0  ;;  %v298_v29 = vld [vmem:[%s2079_s29 + $0x1b8] sm:$0xff]  ;;  %v457_v41 = vadd.f32 %v456_v27, %v293_v17  ;;  %v552_v45 = vadd.f32 %v551_v26, %v550_v33  ;;  %v903_v56 = vsel %vm501_vm1, %v711_v46, 0.0  ;;  %v303_v16 = vld [vmem:[%s2079_s29 + $0x1e0] sm:$0xff]  ;;  %v411_v33 = vld [vmem:[%s2084_s5 + $0x150] sm:$0xff] }
  0x69   : > { %v713_v35 = vmul.f32 %v298_v29, %v298_v29  ;;  %v898_v39 = vadd.f32 %v897_v10, %v896_v25  ;;  %v555_v48 = vsel %vm501_vm1, %v298_v29, 0.0  ;;  %v714_v0 = vmul.f32 %v299_v57, %v299_v57  ;;  %v304_v10 = vld [vmem:[%s2079_s29 + $0x1e8] sm:$0xff] }
  0x6a   : > { %v807_v38 = vadd.f32 %v806_v28, %v706_v20  ;;  %v458_v49 = vadd.f32 %v457_v41, %v295_v36  ;;  %v554_v55 = vadd.f32 %v553_v37, %v552_v45  ;;  %v559_v6 = vsel %vm501_vm1, %v302_v62, 0.0  ;;  %v305_v20 = vld [vmem:[%s2079_s29 + $0x1f0] sm:$0xff]  ;;  %v307_v37 = vld [vmem:[%s2079_s29 + $0x200] sm:$0xff] }
  0x6b   : > { %v900_v47 = vadd.f32 %v899_v34, %v898_v39  ;;  %v905_v54 = vsel %vm501_vm1, %v713_v35, 0.0  ;;  %v561_v17 = vsel %vm501_vm1, %v304_v10, 0.0  ;;  %v718_v22 = vmul.f32 %v303_v16, %v303_v16  ;;  %v309_v41 = vld [vmem:[%s2079_s29 + $0x210] sm:$0xff] }
  0x6c   : > { %1171 = vperm.xlu1 %1839, %v402_v51   ;;  %1166 = vperm.xlu0 %1838, %v401_v52   ;;  %v808_v50 = vadd.f32 %v807_v38, %v708_v21  ;;  %v300_v51 = vld [vmem:[%s2079_s29 + $0x1c8] sm:$0xff]  ;;  %v408_v52 = vld [vmem:[%s2084_s5 + $0x138] sm:$0xff]  ;;  %v459_v63 = vadd.f32 %v458_v49, %v297_v40  ;;  %v556_v3 = vadd.f32 %v555_v48, %v554_v55  ;;  %v909_v23 = vsel %vm501_vm1, %v717_v2, 0.0 }
  0x6d   : > { %v557_v58 = vsel %vm501_vm1, %v300_v51, 0.0  ;;  %v902_v60 = vadd.f32 %v901_v43, %v900_v47  ;;  %v715_v4 = vmul.f32 %v300_v51, %v300_v51  ;;  %v720_v24 = vmul.f32 %v305_v20, %v305_v20  ;;  %v414_v55 = vld [vmem:[%s2084_s5 + $0x168] sm:$0xff] }
  0x6e   : > { %v809_v59 = vadd.f32 %v808_v50, %v710_v42  ;;  %v460_v7 = vadd.f32 %v459_v63, %v299_v57  ;;  %v558_v13 = vadd.f32 %v557_v58, %v556_v3  ;;  %v719_v26 = vmul.f32 %v304_v10, %v304_v10  ;;  %v310_v42 = vld [vmem:[%s2079_s29 + $0x218] sm:$0xff] }
  0x6f   : > { %v904_v5 = vadd.f32 %v903_v56, %v902_v60  ;;  %v907_v14 = vsel %vm501_vm1, %v715_v4, 0.0  ;;  %v724_v45 = vmul.f32 %v309_v41, %v309_v41  ;;  %v725_v46 = vmul.f32 %v310_v42, %v310_v42  ;;  %v413_v56 = vld [vmem:[%s2084_s5 + $0x160] sm:$0xff] }
  0x70   : > { %1181 = vperm.xlu1 %1839, %v404_v8   ;;  %1176 = vperm.xlu0 %1838, %v403_v9   ;;  %v810_v8 = vadd.f32 %v809_v59, %v712_v44  ;;  %v306_v9 = vld [vmem:[%s2079_s29 + $0x1f8] sm:$0xff]  ;;  %v461_v21 = vadd.f32 %v460_v7, %v301_v61  ;;  %v560_v25 = vadd.f32 %v559_v6, %v558_v13  ;;  %v911_v36 = vsel %vm501_vm1, %v719_v26, 0.0  ;;  %v311_v60 = vld [vmem:[%s2079_s29 + $0x220] sm:$0xff]  ;;  %v415_v13 = vld [vmem:[%s2084_s5 + $0x170] sm:$0xff] }
  0x71   : > { %v721_v15 = vmul.f32 %v306_v9, %v306_v9  ;;  %v906_v19 = vadd.f32 %v905_v54, %v904_v5  ;;  %v563_v28 = vsel %vm501_vm1, %v306_v9, 0.0  ;;  %v722_v44 = vmul.f32 %v307_v37, %v307_v37  ;;  %v312_v54 = vld [vmem:[%s2079_s29 + $0x228] sm:$0xff] }
  0x72   : > { %v811_v18 = vadd.f32 %v810_v8, %v714_v0  ;;  %v462_v29 = vadd.f32 %v461_v21, %v303_v16  ;;  %v562_v35 = vadd.f32 %v561_v17, %v560_v25  ;;  %v567_v50 = vsel %vm501_vm1, %v310_v42, 0.0  ;;  %v313_v0 = vld [vmem:[%s2079_s29 + $0x230] sm:$0xff]  ;;  %v315_v17 = vld [vmem:[%s2079_s29 + $0x240] sm:$0xff] }
  0x73   : > { %v908_v27 = vadd.f32 %v907_v14, %v906_v19  ;;  %v913_v34 = vsel %vm501_vm1, %v721_v15, 0.0  ;;  %v569_v61 = vsel %vm501_vm1, %v312_v54, 0.0  ;;  %v726_v2 = vmul.f32 %v311_v60, %v311_v60  ;;  %v317_v21 = vld [vmem:[%s2079_s29 + $0x250] sm:$0xff] }
  0x74   : > { %1191 = vperm.xlu1 %1839, %v406_v31   ;;  %1186 = vperm.xlu0 %1838, %v405_v32   ;;  %v812_v30 = vadd.f32 %v811_v18, %v716_v1  ;;  %v308_v31 = vld [vmem:[%s2079_s29 + $0x208] sm:$0xff]  ;;  %v412_v32 = vld [vmem:[%s2084_s5 + $0x158] sm:$0xff]  ;;  %v463_v43 = vadd.f32 %v462_v29, %v305_v20  ;;  %v564_v47 = vadd.f32 %v563_v28, %v562_v35  ;;  %v917_v3 = vsel %vm501_vm1, %v725_v46, 0.0 }
  0x75   : > { %v565_v38 = vsel %vm501_vm1, %v308_v31, 0.0  ;;  %v910_v40 = vadd.f32 %v909_v23, %v908_v27  ;;  %v723_v48 = vmul.f32 %v308_v31, %v308_v31  ;;  %v728_v4 = vmul.f32 %v313_v0, %v313_v0  ;;  %v418_v35 = vld [vmem:[%s2084_s5 + $0x188] sm:$0xff] }
  0x76   : > { %v813_v39 = vadd.f32 %v812_v30, %v718_v22  ;;  %v464_v51 = vadd.f32 %v463_v43, %v307_v37  ;;  %v566_v57 = vadd.f32 %v565_v38, %v564_v47  ;;  %v727_v6 = vmul.f32 %v312_v54, %v312_v54  ;;  %v318_v22 = vld [vmem:[%s2079_s29 + $0x258] sm:$0xff] }
  0x77   : > { %v912_v49 = vadd.f32 %v911_v36, %v910_v40  ;;  %v915_v58 = vsel %vm501_vm1, %v723_v48, 0.0  ;;  %v732_v25 = vmul.f32 %v317_v21, %v317_v21  ;;  %v733_v26 = vmul.f32 %v318_v22, %v318_v22  ;;  %v417_v36 = vld [vmem:[%s2084_s5 + $0x180] sm:$0xff] }
  0x78   : > { %1201 = vperm.xlu1 %1839, %v408_v52   ;;  %1196 = vperm.xlu0 %1838, %v407_v53   ;;  %v814_v52 = vadd.f32 %v813_v39, %v720_v24  ;;  %v314_v53 = vld [vmem:[%s2079_s29 + $0x238] sm:$0xff]  ;;  %v465_v1 = vadd.f32 %v464_v51, %v309_v41  ;;  %v568_v5 = vadd.f32 %v567_v50, %v566_v57  ;;  %v919_v16 = vsel %vm501_vm1, %v727_v6, 0.0  ;;  %v319_v40 = vld [vmem:[%s2079_s29 + $0x260] sm:$0xff]  ;;  %v419_v57 = vld [vmem:[%s2084_s5 + $0x190] sm:$0xff] }
  0x79   : > { %v729_v59 = vmul.f32 %v314_v53, %v314_v53  ;;  %v914_v63 = vadd.f32 %v913_v34, %v912_v49  ;;  %v571_v8 = vsel %vm501_vm1, %v314_v53, 0.0  ;;  %v730_v24 = vmul.f32 %v315_v17, %v315_v17  ;;  %v320_v34 = vld [vmem:[%s2079_s29 + $0x268] sm:$0xff] }
  0x7a   : > { %v815_v62 = vadd.f32 %v814_v52, %v722_v44  ;;  %v466_v9 = vadd.f32 %v465_v1, %v311_v60  ;;  %v570_v15 = vadd.f32 %v569_v61, %v568_v5  ;;  %v575_v30 = vsel %vm501_vm1, %v318_v22, 0.0  ;;  %v321_v44 = vld [vmem:[%s2079_s29 + $0x270] sm:$0xff]  ;;  %v323_v61 = vld [vmem:[%s2079_s29 + $0x280] sm:$0xff] }
  0x7b   : > { %v916_v7 = vadd.f32 %v915_v58, %v914_v63  ;;  %v921_v14 = vsel %vm501_vm1, %v729_v59, 0.0  ;;  %v577_v41 = vsel %vm501_vm1, %v320_v34, 0.0  ;;  %v734_v46 = vmul.f32 %v319_v40, %v319_v40  ;;  %v325_v1 = vld [vmem:[%s2079_s29 + $0x290] sm:$0xff] }
  0x7c   : > { %1211 = vperm.xlu1 %1839, %v410_v11   ;;  %1206 = vperm.xlu0 %1838, %v409_v12   ;;  %v816_v10 = vadd.f32 %v815_v62, %v724_v45  ;;  %v316_v11 = vld [vmem:[%s2079_s29 + $0x248] sm:$0xff]  ;;  %v416_v12 = vld [vmem:[%s2084_s5 + $0x178] sm:$0xff]  ;;  %v467_v23 = vadd.f32 %v466_v9, %v313_v0  ;;  %v572_v27 = vadd.f32 %v571_v8, %v570_v15  ;;  %v925_v47 = vsel %vm501_vm1, %v733_v26, 0.0 }
  0x7d   : > { %v573_v18 = vsel %vm501_vm1, %v316_v11, 0.0  ;;  %v918_v20 = vadd.f32 %v917_v3, %v916_v7  ;;  %v731_v28 = vmul.f32 %v316_v11, %v316_v11  ;;  %v736_v48 = vmul.f32 %v321_v44, %v321_v44  ;;  %v422_v15 = vld [vmem:[%s2084_s5 + $0x1a8] sm:$0xff] }
  0x7e   : > { %v817_v19 = vadd.f32 %v816_v10, %v726_v2  ;;  %v468_v31 = vadd.f32 %v467_v23, %v315_v17  ;;  %v574_v37 = vadd.f32 %v573_v18, %v572_v27  ;;  %v735_v50 = vmul.f32 %v320_v34, %v320_v34  ;;  %v326_v2 = vld [vmem:[%s2079_s29 + $0x298] sm:$0xff] }
  0x7f   : > { %v920_v29 = vadd.f32 %v919_v16, %v918_v20  ;;  %v923_v38 = vsel %vm501_vm1, %v731_v28, 0.0  ;;  %v740_v5 = vmul.f32 %v325_v1, %v325_v1  ;;  %v741_v6 = vmul.f32 %v326_v2, %v326_v2  ;;  %v421_v16 = vld [vmem:[%s2084_s5 + $0x1a0] sm:$0xff] }
  0x80   : > { %1221 = vperm.xlu1 %1839, %v412_v32   ;;  %1216 = vperm.xlu0 %1838, %v411_v33   ;;  %v818_v32 = vadd.f32 %v817_v19, %v728_v4  ;;  %v322_v33 = vld [vmem:[%s2079_s29 + $0x278] sm:$0xff]  ;;  %v469_v45 = vadd.f32 %v468_v31, %v317_v21  ;;  %v576_v49 = vadd.f32 %v575_v30, %v574_v37  ;;  %v927_v60 = vsel %vm501_vm1, %v735_v50, 0.0  ;;  %v327_v20 = vld [vmem:[%s2079_s29 + $0x2a0] sm:$0xff]  ;;  %v423_v37 = vld [vmem:[%s2084_s5 + $0x1b0] sm:$0xff] }
  0x81   : > { %v737_v39 = vmul.f32 %v322_v33, %v322_v33  ;;  %v922_v43 = vadd.f32 %v921_v14, %v920_v29  ;;  %v579_v52 = vsel %vm501_vm1, %v322_v33, 0.0  ;;  %v738_v4 = vmul.f32 %v323_v61, %v323_v61  ;;  %v328_v14 = vld [vmem:[%s2079_s29 + $0x2a8] sm:$0xff] }
  0x82   : > { %v819_v42 = vadd.f32 %v818_v32, %v730_v24  ;;  %v470_v53 = vadd.f32 %v469_v45, %v319_v40  ;;  %v578_v59 = vadd.f32 %v577_v41, %v576_v49  ;;  %v583_v10 = vsel %vm501_vm1, %v326_v2, 0.0  ;;  %v329_v24 = vld [vmem:[%s2079_s29 + $0x2b0] sm:$0xff]  ;;  %v331_v41 = vld [vmem:[%s2079_s29 + $0x2c0] sm:$0xff] }
  0x83   : > { %v924_v51 = vadd.f32 %v923_v38, %v922_v43  ;;  %v929_v58 = vsel %vm501_vm1, %v737_v39, 0.0  ;;  %v585_v21 = vsel %vm501_vm1, %v328_v14, 0.0  ;;  %v742_v26 = vmul.f32 %v327_v20, %v327_v20  ;;  %v333_v45 = vld [vmem:[%s2079_s29 + $0x2d0] sm:$0xff] }
  0x84   : > { %1231 = vperm.xlu1 %1839, %v414_v55   ;;  %1226 = vperm.xlu0 %1838, %v413_v56   ;;  %v820_v54 = vadd.f32 %v819_v42, %v732_v25  ;;  %v324_v55 = vld [vmem:[%s2079_s29 + $0x288] sm:$0xff]  ;;  %v420_v56 = vld [vmem:[%s2084_s5 + $0x198] sm:$0xff]  ;;  %v471_v3 = vadd.f32 %v470_v53, %v321_v44  ;;  %v580_v7 = vadd.f32 %v579_v52, %v578_v59  ;;  %v933_v27 = vsel %vm501_vm1, %v741_v6, 0.0 }
  0x85   : > { %v581_v62 = vsel %vm501_vm1, %v324_v55, 0.0  ;;  %v926_v0 = vadd.f32 %v925_v47, %v924_v51  ;;  %v739_v8 = vmul.f32 %v324_v55, %v324_v55  ;;  %v744_v28 = vmul.f32 %v329_v24, %v329_v24  ;;  %v426_v59 = vld [vmem:[%s2084_s5 + $0x1c8] sm:$0xff] }
  0x86   : > { %v821_v63 = vadd.f32 %v820_v54, %v734_v46  ;;  %v472_v11 = vadd.f32 %v471_v3, %v323_v61  ;;  %v582_v17 = vadd.f32 %v581_v62, %v580_v7  ;;  %v743_v30 = vmul.f32 %v328_v14, %v328_v14  ;;  %v334_v46 = vld [vmem:[%s2079_s29 + $0x2d8] sm:$0xff] }
  0x87   : > { %v928_v9 = vadd.f32 %v927_v60, %v926_v0  ;;  %v931_v18 = vsel %vm501_vm1, %v739_v8, 0.0  ;;  %v748_v49 = vmul.f32 %v333_v45, %v333_v45  ;;  %v749_v50 = vmul.f32 %v334_v46, %v334_v46  ;;  %v425_v60 = vld [vmem:[%s2084_s5 + $0x1c0] sm:$0xff] }
  0x88   : > { %1241 = vperm.xlu1 %1839, %v416_v12   ;;  %1236 = vperm.xlu0 %1838, %v415_v13   ;;  %v822_v12 = vadd.f32 %v821_v63, %v736_v48  ;;  %v330_v13 = vld [vmem:[%s2079_s29 + $0x2b8] sm:$0xff]  ;;  %v473_v25 = vadd.f32 %v472_v11, %v325_v1  ;;  %v584_v29 = vadd.f32 %v583_v10, %v582_v17  ;;  %v935_v40 = vsel %vm501_vm1, %v743_v30, 0.0  ;;  %v2333_v0 = vld [vmem:[%s2079_s29 + $0x2e0] sm:$0xff]  ;;  %v427_v17 = vld [vmem:[%s2084_s5 + $0x1d0] sm:$0xff] }
  0x89   : > { %v745_v19 = vmul.f32 %v330_v13, %v330_v13  ;;  %v930_v23 = vadd.f32 %v929_v58, %v928_v9  ;;  %v587_v32 = vsel %vm501_vm1, %v330_v13, 0.0  ;;  %v746_v48 = vmul.f32 %v331_v41, %v331_v41  ;;  %v2327_v58 = vld [vmem:[%s2079_s29 + $0x2e8] sm:$0xff] }
  0x8a   : > { %v823_v22 = vadd.f32 %v822_v12, %v738_v4  ;;  %v474_v33 = vadd.f32 %v473_v25, %v327_v20  ;;  %v586_v39 = vadd.f32 %v585_v21, %v584_v29  ;;  %v591_v54 = vsel %vm501_vm1, %v334_v46, 0.0  ;;  %v2338_v4 = vld [vmem:[%s2079_s29 + $0x2f0] sm:$0xff]  ;;  %v2357_v21 = vld [vmem:[%s2079_s29 + $0x300] sm:$0xff] }
  0x8b   : > { %v932_v31 = vadd.f32 %v931_v18, %v930_v23  ;;  %v937_v38 = vsel %vm501_vm1, %v745_v19, 0.0  ;;  %v593_v1 = vsel %vm501_vm1, %v2327_v58, 0.0  ;;  %v750_v6 = vmul.f32 %v2333_v0, %v2333_v0  ;;  %v2362_v25 = vld [vmem:[%s2079_s29 + $0x310] sm:$0xff] }
  0x8c   : > { %1251 = vperm.xlu1 %1839, %v418_v35   ;;  %1246 = vperm.xlu0 %1838, %v417_v36   ;;  %v824_v34 = vadd.f32 %v823_v22, %v740_v5  ;;  %v332_v35 = vld [vmem:[%s2079_s29 + $0x2c8] sm:$0xff]  ;;  %v424_v36 = vld [vmem:[%s2084_s5 + $0x1b8] sm:$0xff]  ;;  %v475_v47 = vadd.f32 %v474_v33, %v329_v24  ;;  %v588_v51 = vadd.f32 %v587_v32, %v586_v39  ;;  %v941_v7 = vsel %vm501_vm1, %v749_v50, 0.0 }
  0x8d   : > { %v589_v42 = vsel %vm501_vm1, %v332_v35, 0.0  ;;  %v934_v44 = vadd.f32 %v933_v27, %v932_v31  ;;  %v747_v52 = vmul.f32 %v332_v35, %v332_v35  ;;  %v752_v8 = vmul.f32 %v2338_v4, %v2338_v4  ;;  %v430_v39 = vld [vmem:[%s2084_s5 + $0x1e8] sm:$0xff] }
  0x8e   : > { %v825_v43 = vadd.f32 %v824_v34, %v742_v26  ;;  %v476_v55 = vadd.f32 %v475_v47, %v331_v41  ;;  %v590_v61 = vadd.f32 %v589_v42, %v588_v51  ;;  %v751_v10 = vmul.f32 %v2327_v58, %v2327_v58  ;;  %v2365_v26 = vld [vmem:[%s2079_s29 + $0x318] sm:$0xff] }
  0x8f   : > { %v936_v53 = vadd.f32 %v935_v40, %v934_v44  ;;  %v939_v62 = vsel %vm501_vm1, %v747_v52, 0.0  ;;  %v756_v29 = vmul.f32 %v2362_v25, %v2362_v25  ;;  %v757_v30 = vmul.f32 %v2365_v26, %v2365_v26  ;;  %v429_v40 = vld [vmem:[%s2084_s5 + $0x1e0] sm:$0xff] }
  0x90   : > { %1261 = vperm.xlu1 %1839, %v420_v56   ;;  %1256 = vperm.xlu0 %1838, %v419_v57   ;;  %v826_v56 = vadd.f32 %v825_v43, %v744_v28  ;;  %v338_v57 = vld [vmem:[%s2079_s29 + $0x2f8] sm:$0xff]  ;;  %v477_v5 = vadd.f32 %v476_v55, %v333_v45  ;;  %v592_v9 = vadd.f32 %v591_v54, %v590_v61  ;;  %v943_v20 = vsel %vm501_vm1, %v751_v10, 0.0  ;;  %v2391_v44 = vld [vmem:[%s2079_s29 + $0x320] sm:$0xff]  ;;  %v2402_v54 = vld [vmem:[%s2079_s29 + $0x330] sm:$0xff] }
  0x91   : > { %v753_v63 = vmul.f32 %v338_v57, %v338_v57  ;;  %v938_v3 = vadd.f32 %v937_v38, %v936_v53  ;;  %v595_v12 = vsel %vm501_vm1, %v338_v57, 0.0  ;;  %v754_v28 = vmul.f32 %v2357_v21, %v2357_v21  ;;  %v2383_v38 = vld [vmem:[%s2079_s29 + $0x328] sm:$0xff]  ;;  %v2422_v10 = vld [vmem:[%s2079_s29 + $0x350] sm:$0xff] }
  0x92   : > { %v827_v2 = vadd.f32 %v826_v56, %v746_v48  ;;  %v478_v13 = vadd.f32 %v477_v5, %v2333_v0  ;;  %v594_v19 = vadd.f32 %v593_v1, %v592_v9  ;;  %v599_v34 = vsel %vm501_vm1, %v2365_v26, 0.0 }
  0x93   : > { %v940_v11 = vadd.f32 %v939_v62, %v938_v3  ;;  %v945_v18 = vsel %vm501_vm1, %v753_v63, 0.0  ;;  %v601_v45 = vsel %vm501_vm1, %v2383_v38, 0.0  ;;  %v949_v50 = vsel %vm501_vm1, %v757_v30, 0.0  ;;  %v2442_v30 = vld [vmem:[%s2079_s29 + $0x378] sm:$0xff] }
  0x94   : > { %1271 = vperm.xlu1 %1839, %v422_v15   ;;  %1266 = vperm.xlu0 %1838, %v421_v16   ;;  %v828_v14 = vadd.f32 %v827_v2, %v748_v49  ;;  %v2350_v15 = vld [vmem:[%s2079_s29 + $0x308] sm:$0xff]  ;;  %v428_v16 = vld [vmem:[%s2084_s5 + $0x1d8] sm:$0xff]  ;;  %v479_v27 = vadd.f32 %v478_v13, %v2338_v4  ;;  %v596_v31 = vadd.f32 %v595_v12, %v594_v19  ;;  %v2427_v12 = vld [vmem:[%s2079_s29 + $0x340] sm:$0xff] }
  0x95   : > { %v597_v22 = vsel %vm501_vm1, %v2350_v15, 0.0  ;;  %v942_v24 = vadd.f32 %v941_v7, %v940_v11  ;;  %v755_v32 = vmul.f32 %v2350_v15, %v2350_v15  ;;  %v758_v49 = vmul.f32 %v2391_v44, %v2391_v44 }
  0x96   : > { %v829_v23 = vadd.f32 %v828_v14, %v750_v6  ;;  %v480_v35 = vadd.f32 %v479_v27, %v2357_v21  ;;  %v598_v41 = vadd.f32 %v597_v22, %v596_v31  ;;  %v759_v52 = vmul.f32 %v2383_v38, %v2383_v38  ;;  %v2418_v6 = vld [vmem:[%s2079_s29 + $0x348] sm:$0xff]  ;;  %v1842_v31 = vld [vmem:[%s2079_s29 + $0x20] sm:$0xff] }
  0x97   : > { %v944_v33 = vadd.f32 %v943_v20, %v942_v24  ;;  %v947_v42 = vsel %vm501_vm1, %v755_v32, 0.0  ;;  %v760_v61 = vmul.f32 %v2402_v54, %v2402_v54  ;;  %v605_v14 = vsel %vm501_vm1, %v2418_v6, 0.0 }
  0x98   : > { %1281 = vperm.xlu1 %1839, %v424_v36   ;;  %1276 = vperm.xlu0 %1838, %v423_v37   ;;  %v830_v36 = vadd.f32 %v829_v23, %v752_v8  ;;  %v2380_v37 = vld [vmem:[%s2079_s29 + $0x338] sm:$0xff]  ;;  %v481_v48 = vadd.f32 %v480_v35, %v2362_v25  ;;  %v600_v51 = vadd.f32 %v599_v34, %v598_v41  ;;  %v951_v5 = vsel %vm501_vm1, %v759_v52, 0.0  ;;  %v1841_v23 = vld [vmem:[%s2079_s29 + $0x8] sm:$0xff]  ;;  %v2458_v52 = vld [vmem:[%s2079_s29 + $0x370] sm:$0xff] }
  0x99   : > { %v761_v43 = vmul.f32 %v2380_v37, %v2380_v37  ;;  %v946_v47 = vadd.f32 %v945_v18, %v944_v33  ;;  %v603_v55 = vsel %vm501_vm1, %v2380_v37, 0.0  ;;  %v764_v19 = vmul.f32 %v2422_v10, %v2422_v10  ;;  %v1843_v33 = vld [vmem:[%s2079_s29] sm:$0xff] }
  0x9a   : > { %v831_v46 = vadd.f32 %v830_v36, %v754_v28  ;;  %v482_v56 = vadd.f32 %v481_v48, %v2391_v44  ;;  %v602_v63 = vadd.f32 %v601_v45, %v600_v51  ;;  %v762_v22 = vmul.f32 %v2427_v12, %v2427_v12  ;;  %v1845_v48 = vld [vmem:[%s2079_s29 + $0x10] sm:$0xff] }
  0x9b   : > { %v948_v53 = vadd.f32 %v947_v42, %v946_v47  ;;  %v953_v62 = vsel %vm501_vm1, %v761_v43, 0.0  ;;  %v2448_v36 = vsel %vm501_vm1, %v2442_v30, 0.0  ;;  %v769_v45 = vmul.f32 %v2442_v30, %v2442_v30 }
  0x9c   : > { %1291 = vperm.xlu1 %1839, %v426_v59   ;;  %1286 = vperm.xlu0 %1838, %v425_v60   ;;  %v832_v57 = vadd.f32 %v831_v46, %v756_v29  ;;  %v2408_v59 = vld [vmem:[%s2079_s29 + $0x358] sm:$0xff]  ;;  %v431_v60 = vld [vmem:[%s2084_s5 + $0x1f0] sm:$0xff]  ;;  %v483_v7 = vadd.f32 %v482_v56, %v2402_v54  ;;  %v604_v13 = vadd.f32 %v603_v55, %v602_v63 }
  0x9d   : > { %v765_v1 = vmul.f32 %v2408_v59, %v2408_v59  ;;  %v950_v3 = vadd.f32 %v949_v50, %v948_v53  ;;  %v607_v11 = vsel %vm501_vm1, %v2408_v59, 0.0  ;;  %v1844_v46 = vld [vmem:[%s2079_s29 + $0x38] sm:$0xff]  ;;  %v1847_v56 = vld [vmem:[%s2079_s29 + $0x30] sm:$0xff] }
  0x9e   : > { %v833_v2 = vadd.f32 %v832_v57, %v758_v49  ;;  %v484_v28 = vadd.f32 %v483_v7, %v2427_v12  ;;  %v606_v35 = vadd.f32 %v605_v14, %v604_v13  ;;  %v1846_v50 = vld [vmem:[%s2079_s29 + $0x18] sm:$0xff]  ;;  %v2475_v13 = vld [vmem:[%s2079_s29 + $0x360] sm:$0xff] }
  0x9f   : > { %v957_v20 = vsel %vm501_vm1, %v765_v1, 0.0  ;;  %v952_v27 = vadd.f32 %v951_v5, %v950_v3 }
  0xa0   : > { %1301 = vperm.xlu1 %1839, %v428_v16   ;;  %1296 = vperm.xlu0 %1838, %v427_v17   ;;  %v763_v16 = vmul.f32 %v2418_v6, %v2418_v6  ;;  %v1840_v17 = vld [vmem:[%s2079_s29 + $0x28] sm:$0xff]  ;;  %v834_v29 = vadd.f32 %v833_v2, %v760_v61  ;;  %v485_v53 = vadd.f32 %v484_v28, %v2422_v10 }
  0xa1   : > { %v954_v42 = vadd.f32 %v953_v62, %v952_v27  ;;  %v2465_v61 = vmul.f32 %v2458_v52, %v2458_v52  ;;  %v2469_v2 = vld [vmem:[%s2079_s29 + $0x368] sm:$0xff]  ;;  %v608_v3 = vadd.f32 %v607_v11, %v606_v35  ;;  %v1848_v11 = vld [vmem:[%s2079_s29 + $0x58] sm:$0xff] }
  0xa2   : > { %v955_v43 = vsel %vm501_vm1, %v763_v16, 0.0  ;;  %v609_v14 = vsel %vm501_vm1, %v2469_v2, 0.0  ;;  %v767_v16 = vmul.f32 %v2469_v2, %v2469_v2  ;;  %v1849_v27 = vld [vmem:[%s2079_s29 + $0x48] sm:$0xff] }
  0xa3   : > { %v956_v1 = vadd.f32 %v955_v43, %v954_v42 }
  0xa4   : > { %1311 = vperm.xlu1 %1839, %v430_v39   ;;  %1306 = vperm.xlu0 %1838, %v429_v40  }
  0xa7   : > { %v1017_v8 = vpop.permute.xlu1 %1016  ;;  %v1007_v9 = vpop.permute.xlu0 %1006 }
  0xa8   : > { %v1324_v18 = vmul.f32 %v1840_v17, %v1017_v8  ;;  %1316 = vperm.xlu0 %1838, %v431_v60   ;;  %v1320_v24 = vmul.f32 %v1841_v23, %v1007_v9  ;;  %v1323_v32 = vmul.f32 %v1842_v31, %v1017_v8  ;;  %v1319_v34 = vmul.f32 %v1843_v33, %v1007_v9  ;;  %v1850_v33 = vld [vmem:[%s2079_s29 + $0x40] sm:$0xff] }
  0xa9   : > { %v835_v60 = vadd.f32 %v834_v29, %v762_v22  ;;  %v2472_v9 = vsel %vm501_vm1, %v769_v45, 0.0  ;;  %v486_v23 = vadd.f32 %v485_v53, %v2475_v13  ;;  %v766_v29 = vmul.f32 %v2475_v13, %v2475_v13 }
  0xaa   : > { %v1516_v39 = vsel %vm501_vm1, %v1324_v18, 0.0  ;;  %v1513_v55 = vsel %vm501_vm1, %v1320_v24, 0.0 }
  0xab   : > { %v1022_v40 = vpop.permute.xlu1 %1021  ;;  %v1012_v41 = vpop.permute.xlu0 %1011  ;;  %v836_v31 = vadd.f32 %v835_v60, %v764_v19 }
  0xac   : > { %v1326_v47 = vmul.f32 %v1844_v46, %v1022_v40  ;;  %v1321_v49 = vmul.f32 %v1845_v48, %v1012_v41  ;;  %v1322_v51 = vmul.f32 %v1846_v50, %v1012_v41  ;;  %v1325_v57 = vmul.f32 %v1847_v56, %v1022_v40  ;;  %v2492_v48 = vld [vmem:[%s2079_s29 + $0x398] sm:$0xff] }
  0xad   : > { %v610_v40 = vadd.f32 %v609_v14, %v608_v3  ;;  %v958_v41 = vadd.f32 %v957_v20, %v956_v1  ;;  %v1852_v50 = vld [vmem:[%s2079_s29 + $0x78] sm:$0xff]  ;;  %v2498_v20 = vsel %vm501_vm1, %v2492_v48, 0.0  ;;  %v773_v60 = vmul.f32 %v2492_v48, %v2492_v48  ;;  %v1855_v1 = vld [vmem:[%s2079_s29 + $0x60] sm:$0xff] }
  0xae   : > { %v1445_v62 = vadd.f32 %v1321_v49, %v1319_v34  ;;  %v1514_v63 = vsel %vm501_vm1, %v1322_v51, 0.0  ;;  %v1518_v17 = vsel %vm501_vm1, %v1326_v47, 0.0  ;;  %v959_v47 = vsel %vm501_vm1, %v767_v16, 0.0 }
  0xaf   : > { %v1515_v5 = vadd.f32 %v1514_v63, %v1513_v55  ;;  %v1032_v7 = vpop.permute.xlu1 %1031  ;;  %v1027_v8 = vpop.permute.xlu0 %1026  ;;  %v1853_v55 = vld [vmem:[%s2079_s29 + $0x68] sm:$0xff] }
  0xb0   : > { %v1446_v18 = vadd.f32 %v1445_v62, %v1323_v32  ;;  %v1330_v22 = vmul.f32 %v1848_v11, %v1032_v7  ;;  %v1328_v28 = vmul.f32 %v1849_v27, %v1027_v8  ;;  %v1327_v34 = vmul.f32 %v1850_v33, %v1027_v8  ;;  %v1851_v32 = vld [vmem:[%s2079_s29 + $0x50] sm:$0xff] }
  0xb1   : > { %v1517_v24 = vadd.f32 %v1516_v39, %v1515_v5  ;;  %v1329_v42 = vmul.f32 %v1851_v32, %v1032_v7  ;;  %v1854_v62 = vld [vmem:[%s2079_s29 + $0x70] sm:$0xff]  ;;  %v960_v7 = vadd.f32 %v959_v47, %v958_v41  ;;  %v1857_v41 = vld [vmem:[%s2079_s29 + $0x88] sm:$0xff]  ;;  %v2529_v47 = vld [vmem:[%s2079_s29 + $0x380] sm:$0xff] }
  0xb2   : > { %v1447_v35 = vadd.f32 %v1446_v18, %v1325_v57  ;;  %v1522_v43 = vsel %vm501_vm1, %v1330_v22, 0.0  ;;  %v1520_v49 = vsel %vm501_vm1, %v1328_v28, 0.0  ;;  %v837_v57 = vadd.f32 %v836_v31, %v766_v29  ;;  %v2506_v8 = vld [vmem:[%s2079_s29 + $0x390] sm:$0xff]  ;;  %v2519_v29 = vld [vmem:[%s2079_s29 + $0x388] sm:$0xff] }
  0xb3   : > { %v1519_v39 = vadd.f32 %v1518_v17, %v1517_v24  ;;  %v1042_v45 = vpop.permute.xlu1 %1041  ;;  %v1037_v46 = vpop.permute.xlu0 %1036  ;;  %v2511_v11 = vmul.f32 %v2506_v8, %v2506_v8  ;;  %v487_v22 = vadd.f32 %v486_v23, %v2458_v52  ;;  %v2516_v28 = vsel %vm501_vm1, %v773_v60, 0.0  ;;  %v1858_v23 = vld [vmem:[%s2079_s29 + $0x98] sm:$0xff] }
  0xb4   : > { %v1448_v19 = vadd.f32 %v1447_v35, %v1327_v34  ;;  %v1334_v51 = vmul.f32 %v1852_v50, %v1042_v45  ;;  %v1332_v56 = vmul.f32 %v1853_v55, %v1037_v46  ;;  %v1333_v63 = vmul.f32 %v1854_v62, %v1042_v45  ;;  %v1856_v34 = vld [vmem:[%s2079_s29 + $0x90] sm:$0xff]  ;;  %v1860_v60 = vld [vmem:[%s2079_s29 + $0xb8] sm:$0xff] }
  0xb5   : > { %v1521_v53 = vadd.f32 %v1520_v49, %v1519_v39  ;;  %v1331_v3 = vmul.f32 %v1855_v1, %v1037_v46  ;;  %v612_v31 = vadd.f32 %v2448_v36, %v610_v40  ;;  %v1859_v39 = vld [vmem:[%s2079_s29 + $0x80] sm:$0xff]  ;;  %v771_v36 = vmul.f32 %v2519_v29, %v2519_v29 }
  0xb6   : > { %v1449_v5 = vadd.f32 %v1448_v19, %v1329_v42  ;;  %v1526_v14 = vsel %vm501_vm1, %v1334_v51, 0.0  ;;  %v1524_v27 = vsel %vm501_vm1, %v1332_v56, 0.0  ;;  %v613_v42 = vsel %vm501_vm1, %v2519_v29, 0.0 }
  0xb7   : > { %v1523_v16 = vadd.f32 %v1522_v43, %v1521_v53  ;;  %v1052_v17 = vpop.permute.xlu1 %1051  ;;  %v1047_v18 = vpop.permute.xlu0 %1046  ;;  %v488_v50 = vadd.f32 %v487_v22, %v2529_v47  ;;  %v770_v51 = vmul.f32 %v2529_v47, %v2529_v47  ;;  %v838_v53 = vadd.f32 %v837_v57, %v2465_v61  ;;  %v1863_v61 = vld [vmem:[%s2079_s29 + $0xa0] sm:$0xff] }
  0xb8   : > { %v1450_v24 = vadd.f32 %v1449_v5, %v1331_v3  ;;  %v1337_v35 = vmul.f32 %v1856_v34, %v1052_v17  ;;  %v1336_v32 = vmul.f32 %v1857_v41, %v1047_v18  ;;  %v1338_v43 = vmul.f32 %v1858_v23, %v1052_v17  ;;  %v1861_v3 = vld [vmem:[%s2079_s29 + $0xa8] sm:$0xff]  ;;  %v1864_v23 = vld [vmem:[%s2079_s29 + $0xd8] sm:$0xff] }
  0xb9   : > { %v1525_v33 = vadd.f32 %v1524_v27, %v1523_v16  ;;  %v1335_v45 = vmul.f32 %v1859_v39, %v1047_v18  ;;  %v963_v16 = vsel %vm501_vm1, %v771_v36, 0.0  ;;  %v1862_v18 = vld [vmem:[%s2079_s29 + $0xb0] sm:$0xff]  ;;  %v2546_v27 = vld [vmem:[%s2079_s29 + $0x3b8] sm:$0xff]  ;;  %v839_v34 = vadd.f32 %v838_v53, %v770_v51  ;;  %v1867_v53 = vld [vmem:[%s2079_s29 + $0xc0] sm:$0xff] }
  0xba   : > { %v1451_v46 = vadd.f32 %v1450_v24, %v1333_v63  ;;  %v1528_v56 = vsel %vm501_vm1, %v1336_v32, 0.0  ;;  %v962_v63 = vadd.f32 %v2472_v9, %v960_v7  ;;  %v1530_v17 = vsel %vm501_vm1, %v1338_v43, 0.0  ;;  %v2555_v36 = vld [vmem:[%s2079_s29 + $0x3b0] sm:$0xff] }
  0xbb   : > { %v1527_v40 = vadd.f32 %v1526_v14, %v1525_v33  ;;  %v1062_v19 = vpop.permute.xlu1 %1061  ;;  %v1057_v49 = vpop.permute.xlu0 %1056  ;;  %v614_v14 = vadd.f32 %v613_v42, %v612_v31  ;;  %v777_v41 = vmul.f32 %v2546_v27, %v2546_v27 }
  0xbc   : > { %v1452_v55 = vadd.f32 %v1451_v46, %v1335_v45  ;;  %v1342_v62 = vmul.f32 %v1860_v60, %v1062_v19  ;;  %v1340_v5 = vmul.f32 %v1861_v3, %v1057_v49  ;;  %v1341_v22 = vmul.f32 %v1862_v18, %v1062_v19  ;;  %v1865_v45 = vld [vmem:[%s2079_s29 + $0xc8] sm:$0xff] }
  0xbd   : > { %v1529_v1 = vadd.f32 %v1528_v56, %v1527_v40  ;;  %v1339_v57 = vmul.f32 %v1863_v61, %v1057_v49  ;;  %v2559_v40 = vsel %vm501_vm1, %v2546_v27, 0.0  ;;  %v489_v19 = vadd.f32 %v488_v50, %v2506_v8  ;;  %v1866_v49 = vld [vmem:[%s2079_s29 + $0xd0] sm:$0xff]  ;;  %v2573_v50 = vld [vmem:[%s2079_s29 + $0x3a0] sm:$0xff] }
  0xbe   : > { %v1453_v24 = vadd.f32 %v1452_v55, %v1337_v35  ;;  %v1534_v9 = vsel %vm501_vm1, %v1342_v62, 0.0  ;;  %v1532_v42 = vsel %vm501_vm1, %v1340_v5, 0.0  ;;  %v964_v35 = vadd.f32 %v963_v16, %v962_v63  ;;  %v2576_v16 = vld [vmem:[%s2079_s29 + $0x3a8] sm:$0xff] }
  0xbf   : > { %v1531_v7 = vadd.f32 %v1530_v17, %v1529_v1  ;;  %v1072_v33 = vpop.permute.xlu1 %1071  ;;  %v1067_v31 = vpop.permute.xlu0 %1066  ;;  %v2566_v60 = vmul.f32 %v2555_v36, %v2555_v36  ;;  %v2570_v5 = vsel %vm501_vm1, %v777_v41, 0.0  ;;  %v616_v17 = vadd.f32 %v2498_v20, %v614_v14 }
  0xc0   : > { %v1454_v32 = vadd.f32 %v1453_v24, %v1339_v57  ;;  %v1346_v43 = vmul.f32 %v1864_v23, %v1072_v33  ;;  %v1344_v46 = vmul.f32 %v1865_v45, %v1067_v31  ;;  %v1345_v51 = vmul.f32 %v1866_v49, %v1072_v33  ;;  %v1869_v33 = vld [vmem:[%s2079_s29 + $0xe8] sm:$0xff] }
  0xc1   : > { %v1533_v39 = vadd.f32 %v1532_v42, %v1531_v7  ;;  %v1343_v55 = vmul.f32 %v1867_v53, %v1067_v31  ;;  %v490_v61 = vadd.f32 %v489_v19, %v2573_v50  ;;  %v617_v57 = vsel %vm501_vm1, %v2576_v16, 0.0 }
  0xc2   : > { %v1455_v56 = vadd.f32 %v1454_v32, %v1341_v22  ;;  %v1538_v62 = vsel %vm501_vm1, %v1346_v43, 0.0  ;;  %v1536_v22 = vsel %vm501_vm1, %v1344_v46, 0.0  ;;  %v775_v41 = vmul.f32 %v2576_v16, %v2576_v16  ;;  %v1870_v32 = vld [vmem:[%s2079_s29 + $0xe0] sm:$0xff]  ;;  %v1871_v43 = vld [vmem:[%s2079_s29 + $0xf0] sm:$0xff] }
  0xc3   : > { %v1535_v63 = vadd.f32 %v1534_v9, %v1533_v39  ;;  %v1082_v1 = vpop.permute.xlu1 %1081  ;;  %v1077_v3 = vpop.permute.xlu0 %1076  ;;  %v1868_v9 = vld [vmem:[%s2079_s29 + $0xf8] sm:$0xff]  ;;  %v774_v42 = vmul.f32 %v2573_v50, %v2573_v50  ;;  %v840_v23 = vadd.f32 %v839_v34, %v2511_v11  ;;  %v618_v49 = vadd.f32 %v617_v57, %v616_v17  ;;  %v1875_v17 = vld [vmem:[%s2079_s29 + $0x100] sm:$0xff] }
  0xc4   : > { %v1456_v18 = vadd.f32 %v1455_v56, %v1343_v55  ;;  %v1350_v7 = vmul.f32 %v1868_v9, %v1082_v1  ;;  %v1348_v31 = vmul.f32 %v1869_v33, %v1077_v3  ;;  %v1347_v20 = vmul.f32 %v1870_v32, %v1077_v3 }
  0xc5   : > { %v1537_v24 = vadd.f32 %v1536_v22, %v1535_v63  ;;  %v1349_v39 = vmul.f32 %v1871_v43, %v1082_v1  ;;  %v966_v53 = vadd.f32 %v2516_v28, %v964_v35  ;;  %v967_v3 = vsel %vm501_vm1, %v775_v41, 0.0  ;;  %v1874_v28 = vld [vmem:[%s2079_s29 + $0x110] sm:$0xff] }
  0xc6   : > { %v1457_v14 = vadd.f32 %v1456_v18, %v1345_v51  ;;  %v1540_v56 = vsel %vm501_vm1, %v1348_v31, 0.0  ;;  %v1872_v51 = vld [vmem:[%s2079_s29 + $0x118] sm:$0xff]  ;;  %v1542_v11 = vsel %vm501_vm1, %v1350_v7, 0.0  ;;  %v841_v9 = vadd.f32 %v840_v23, %v774_v42  ;;  %v2614_v23 = vld [vmem:[%s2079_s29 + $0x3d0] sm:$0xff] }
  0xc7   : > { %v1539_v45 = vadd.f32 %v1538_v62, %v1537_v24  ;;  %v1092_v46 = vpop.permute.xlu1 %1091  ;;  %v1087_v19 = vpop.permute.xlu0 %1086  ;;  %v2597_v18 = vld [vmem:[%s2079_s29 + $0x3d8] sm:$0xff]  ;;  %v1873_v62 = vld [vmem:[%s2079_s29 + $0x108] sm:$0xff]  ;;  %v968_v41 = vadd.f32 %v967_v3, %v966_v53  ;;  %v2619_v53 = vmul.f32 %v2614_v23, %v2614_v23  ;;  %v1879_v3 = vld [vmem:[%s2079_s29 + $0x120] sm:$0xff] }
  0xc8   : > { %v1458_v55 = vadd.f32 %v1457_v14, %v1347_v20  ;;  %v1354_v63 = vmul.f32 %v1872_v51, %v1092_v46  ;;  %v1352_v1 = vmul.f32 %v1873_v62, %v1087_v19  ;;  %v2603_v22 = vsel %vm501_vm1, %v2597_v18, 0.0  ;;  %v1878_v51 = vld [vmem:[%s2079_s29 + $0x130] sm:$0xff]  ;;  %v2628_v62 = vld [vmem:[%s2079_s29 + $0x3c0] sm:$0xff] }
  0xc9   : > { %v1541_v34 = vadd.f32 %v1540_v56, %v1539_v45  ;;  %v1353_v35 = vmul.f32 %v1874_v28, %v1092_v46  ;;  %v1351_v57 = vmul.f32 %v1875_v17, %v1087_v19  ;;  %v781_v32 = vmul.f32 %v2597_v18, %v2597_v18  ;;  %v1877_v19 = vld [vmem:[%s2079_s29 + $0x128] sm:$0xff]  ;;  %2850 = vst [vmem:[#allocation11_spill] sm:$0xff] %v2628_v62 }
  0xca   : > { %v1459_v24 = vadd.f32 %v1458_v55, %v1349_v39  ;;  %v491_v20 = vadd.f32 %v490_v61, %v2555_v36  ;;  %v1546_v14 = vsel %vm501_vm1, %v1354_v63, 0.0  ;;  %v1544_v45 = vsel %vm501_vm1, %v1352_v1, 0.0  ;;  %v1876_v39 = vld [vmem:[%s2079_s29 + $0x138] sm:$0xff]  ;;  %v2622_v56 = vld [vmem:[%s2079_s29 + $0x3c8] sm:$0xff] }
  0xcb   : > { %v1543_v33 = vadd.f32 %v1542_v11, %v1541_v34  ;;  %v1102_v31 = vpop.permute.xlu1 %1101  ;;  %v1097_v7 = vpop.permute.xlu0 %1096  ;;  %v620_v61 = vadd.f32 %v2559_v40, %v618_v49  ;;  %v621_v1 = vsel %vm501_vm1, %v2622_v56, 0.0  ;;  %v2634_v40 = vsel %vm501_vm1, %v781_v32, 0.0 }
  0xcc   : > { %v1460_v43 = vadd.f32 %v1459_v24, %v1351_v57  ;;  %v1358_v42 = vmul.f32 %v1876_v39, %v1102_v31  ;;  %v1356_v55 = vmul.f32 %v1877_v19, %v1097_v7  ;;  %v1357_v63 = vmul.f32 %v1878_v51, %v1102_v31  ;;  %v1880_v31 = vld [vmem:[%s2079_s29 + $0x158] sm:$0xff]  ;;  %v1881_v39 = vld [vmem:[%s2079_s29 + $0x148] sm:$0xff] }
  0xcd   : > { %v1545_v46 = vadd.f32 %v1544_v45, %v1543_v33  ;;  %v1355_v11 = vmul.f32 %v1879_v3, %v1097_v7  ;;  %v492_v49 = vadd.f32 %v491_v20, %v2628_v62  ;;  %v778_v32 = vmul.f32 %v2628_v62, %v2628_v62 }
  0xce   : > { %v1461_v34 = vadd.f32 %v1460_v43, %v1353_v35  ;;  %v1550_v28 = vsel %vm501_vm1, %v1358_v42, 0.0  ;;  %v1548_v35 = vsel %vm501_vm1, %v1356_v55, 0.0  ;;  %v779_v43 = vmul.f32 %v2622_v56, %v2622_v56  ;;  %v1883_v55 = vld [vmem:[%s2079_s29 + $0x150] sm:$0xff] }
  0xcf   : > { %v1547_v17 = vadd.f32 %v1546_v14, %v1545_v46  ;;  %v1112_v57 = vpop.permute.xlu1 %1111  ;;  %v1107_v24 = vpop.permute.xlu0 %1106  ;;  %v622_v14 = vadd.f32 %v621_v1, %v620_v61  ;;  %v1882_v46 = vld [vmem:[%s2079_s29 + $0x140] sm:$0xff]  ;;  %v842_v51 = vadd.f32 %v841_v9, %v2566_v60  ;;  %v2009_v9 = vmov 1966171168  }
  0xd0   : > { %v1462_v33 = vadd.f32 %v1461_v34, %v1355_v11  ;;  %v1362_v7 = vmul.f32 %v1880_v31, %v1112_v57  ;;  %v1360_v42 = vmul.f32 %v1881_v39, %v1107_v24  ;;  %v1359_v19 = vmul.f32 %v1882_v46, %v1107_v24  ;;  %v1884_v39 = vld [vmem:[%s2079_s29 + $0x178] sm:$0xff] }
  0xd1   : > { %v1549_v45 = vadd.f32 %v1548_v35, %v1547_v17  ;;  %v1361_v3 = vmul.f32 %v1883_v55, %v1112_v57  ;;  %v970_v31 = vadd.f32 %v2570_v5, %v968_v41  ;;  %v971_v24 = vsel %vm501_vm1, %v779_v43, 0.0 }
  0xd2   : > { %v1463_v20 = vadd.f32 %v1462_v33, %v1357_v63  ;;  %v1554_v11 = vsel %vm501_vm1, %v1362_v7, 0.0  ;;  %v1552_v1 = vsel %vm501_vm1, %v1360_v42, 0.0  ;;  %v1885_v33 = vld [vmem:[%s2079_s29 + $0x168] sm:$0xff]  ;;  %v637_v57 = vunpack.c.l.s4 %v2009_v9  ;;  %v2663_v9 = vld [vmem:[%s2079_s29 + $0x3e0] sm:$0xff] }
  0xd3   : > { %v1551_v34 = vadd.f32 %v1550_v28, %v1549_v45  ;;  %v1122_v17 = vpop.permute.xlu1 %1121  ;;  %v1117_v35 = vpop.permute.xlu0 %1116  ;;  %v2846_v7 = vlaneseq  ;;  %v1886_v28 = vld [vmem:[%s2079_s29 + $0x160] sm:$0xff]  ;;  %v843_v55 = vadd.f32 %v842_v51, %v778_v32  ;;  %v493_v5 = vadd.f32 %v492_v49, %v2614_v23  ;;  %v1888_v51 = vld [vmem:[%s2079_s29 + $0x198] sm:$0xff]  ;;  %2851 = vst [vmem:[#allocation12_spill] sm:$0xff] %v2663_v9 }
  0xd4   : > { %v1464_v61 = vadd.f32 %v1463_v20, %v1359_v19  ;;  %v1366_v62 = vmul.f32 %v1884_v39, %v1122_v17  ;;  %v1364_v60 = vmul.f32 %v1885_v33, %v1117_v35  ;;  %v1363_v45 = vmul.f32 %v1886_v28, %v1117_v35  ;;  %v1889_v35 = vld [vmem:[%s2079_s29 + $0x188] sm:$0xff] }
  0xd5   : > { %v1553_v63 = vadd.f32 %v1552_v1, %v1551_v34  ;;  %v638_v43 = vunpack.c.0.s8 %v637_v57  ;;  %v640_v20 = vshrl.u32 %v2846_v7, 7  ;;  %v624_v34 = vadd.f32 %v2603_v22, %v622_v14  ;;  %v1887_v1 = vld [vmem:[%s2079_s29 + $0x170] sm:$0xff]  ;;  %v2666_v57 = vld [vmem:[%s2079_s29 + $0x3e8] sm:$0xff]  ;;  %v1890_v22 = vld [vmem:[%s2079_s29 + $0x180] sm:$0xff] }
  0xd6   : > { %v1465_v46 = vadd.f32 %v1464_v61, %v1361_v3  ;;  %v1365_v39 = vmul.f32 %v1887_v1, %v1122_v17  ;;  %v1556_v32 = vsel %vm501_vm1, %v1364_v60, 0.0  ;;  %v1558_v49 = vsel %vm501_vm1, %v1366_v62, 0.0 }
  0xd7   : > { %v1555_v41 = vadd.f32 %v1554_v11, %v1553_v63  ;;  %v1132_v42 = vpop.permute.xlu1 %1131  ;;  %v1127_v19 = vpop.permute.xlu0 %1126  ;;  %v972_v63 = vadd.f32 %v971_v24, %v970_v31  ;;  %v494_v28 = vadd.f32 %v493_v5, %v2663_v9  ;;  %v625_v60 = vsel %vm501_vm1, %v2666_v57, 0.0 }
  0xd8   : > { %v1466_v33 = vadd.f32 %v1465_v46, %v1363_v45  ;;  %v1370_v3 = vmul.f32 %v1888_v51, %v1132_v42  ;;  %v1368_v61 = vmul.f32 %v1889_v35, %v1127_v19  ;;  %v1367_v14 = vmul.f32 %v1890_v22, %v1127_v19  ;;  %v1891_v45 = vld [vmem:[%s2079_s29 + $0x190] sm:$0xff]  ;;  %v1893_v35 = vld [vmem:[%s2079_s29 + $0x1a8] sm:$0xff] }
  0xd9   : > { %v1557_v11 = vadd.f32 %v1556_v32, %v1555_v41  ;;  %v1369_v62 = vmul.f32 %v1891_v45, %v1132_v42  ;;  %v2673_v24 = vsub.s32 %v638_v43, %v640_v20  ;;  %v626_v1 = vadd.f32 %v625_v60, %v624_v34  ;;  %v1895_v34 = vld [vmem:[%s2079_s29 + $0x1b0] sm:$0xff] }
  0xda   : > { %v1467_v17 = vadd.f32 %v1466_v33, %v1365_v39  ;;  %v1562_v32 = vsel %vm501_vm1, %v1370_v3, 0.0  ;;  %v1560_v39 = vsel %vm501_vm1, %v1368_v61, 0.0  ;;  %v1892_v33 = vld [vmem:[%s2079_s29 + $0x1b8] sm:$0xff]  ;;  %v495_v7 = vrot.slane %v494_v28, 4 }
  0xdb   : > { %v1559_v46 = vadd.f32 %v1558_v49, %v1557_v11  ;;  %v1142_v41 = vpop.permute.xlu1 %1141  ;;  %v1137_v31 = vpop.permute.xlu0 %1136  ;;  %v627_v42 = vrot.slane %v626_v1, 4  ;;  %v1894_v49 = vld [vmem:[%s2079_s29 + $0x1a0] sm:$0xff]  ;;  %v782_v43 = vmul.f32 %v2663_v9, %v2663_v9  ;;  %v844_v20 = vadd.f32 %v843_v55, %v2619_v53 }
  0xdc   : > { %v1468_v19 = vadd.f32 %v1467_v17, %v1367_v14  ;;  %v1374_v5 = vmul.f32 %v1892_v33, %v1142_v41  ;;  %v1372_v22 = vmul.f32 %v1893_v35, %v1137_v31  ;;  %v1371_v11 = vmul.f32 %v1894_v49, %v1137_v31  ;;  %v1896_v31 = vld [vmem:[%s2079_s29 + $0x1d8] sm:$0xff]  ;;  %v1897_v49 = vld [vmem:[%s2079_s29 + $0x1c8] sm:$0xff] }
  0xdd   : > { %v1561_v51 = vadd.f32 %v1560_v39, %v1559_v46  ;;  %v1373_v3 = vmul.f32 %v1895_v34, %v1142_v41  ;;  %v496_v60 = vadd.f32 %v495_v7, %v494_v28  ;;  %v628_v46 = vadd.f32 %v627_v42, %v626_v1  ;;  %v1898_v41 = vld [vmem:[%s2079_s29 + $0x1c0] sm:$0xff]  ;;  %v1899_v1 = vld [vmem:[%s2079_s29 + $0x1d0] sm:$0xff] }
  0xde   : > { %v1469_v45 = vadd.f32 %v1468_v19, %v1369_v62  ;;  %v1566_v39 = vsel %vm501_vm1, %v1374_v5, 0.0  ;;  %v1564_v62 = vsel %vm501_vm1, %v1372_v22, 0.0  ;;  %v783_v7 = vmul.f32 %v2666_v57, %v2666_v57 }
  0xdf   : > { %v1563_v61 = vadd.f32 %v1562_v32, %v1561_v51  ;;  %v1152_v14 = vpop.permute.xlu1 %1151  ;;  %v1147_v17 = vpop.permute.xlu0 %1146  ;;  %v497_v53 = vrot.slane %v496_v60, 2  ;;  %v629_v55 = vrot.slane %v628_v46, 2  ;;  %v845_v28 = vadd.f32 %v844_v20, %v782_v43 }
  0xe0   : > { %v1470_v33 = vadd.f32 %v1469_v45, %v1371_v11  ;;  %v1378_v19 = vmul.f32 %v1896_v31, %v1152_v14  ;;  %v1376_v9 = vmul.f32 %v1897_v49, %v1147_v17  ;;  %v1375_v34 = vmul.f32 %v1898_v41, %v1147_v17  ;;  %v1900_v31 = vld [vmem:[%s2079_s29 + $0x1e8] sm:$0xff] }
  0xe1   : > { %v1565_v35 = vadd.f32 %v1564_v62, %v1563_v61  ;;  %v1377_v5 = vmul.f32 %v1899_v1, %v1152_v14  ;;  %v498_v11 = vadd.f32 %v497_v53, %v496_v60  ;;  %v630_v45 = vadd.f32 %v629_v55, %v628_v46  ;;  %v1901_v14 = vld [vmem:[%s2079_s29 + $0x1f8] sm:$0xff] }
  0xe2   : > { %v1471_v32 = vadd.f32 %v1470_v33, %v1373_v3  ;;  %v1570_v61 = vsel %vm501_vm1, %v1378_v19, 0.0  ;;  %v1568_v17 = vsel %vm501_vm1, %v1376_v9, 0.0  ;;  %v974_v3 = vadd.f32 %v2634_v40, %v972_v63 }
  0xe3   : > { %v1567_v51 = vadd.f32 %v1566_v39, %v1565_v35  ;;  %v1162_v22 = vpop.permute.xlu1 %1161  ;;  %v1157_v42 = vpop.permute.xlu0 %1156  ;;  %v499_v20 = vrot.slane %v498_v11, 1  ;;  %v631_v49 = vrot.slane %v630_v45, 1  ;;  %v1902_v35 = vld [vmem:[%s2079_s29 + $0x1e0] sm:$0xff]  ;;  %v846_v46 = vrot.slane %v845_v28, 4 }
  0xe4   : > { %v1472_v62 = vadd.f32 %v1471_v32, %v1375_v34  ;;  %v1380_v43 = vmul.f32 %v1900_v31, %v1157_v42  ;;  %v1382_v39 = vmul.f32 %v1901_v14, %v1162_v22  ;;  %v1379_v41 = vmul.f32 %v1902_v35, %v1157_v42  ;;  %v1903_v34 = vld [vmem:[%s2079_s29 + $0x1f0] sm:$0xff]  ;;  %v1905_v14 = vld [vmem:[%s2079_s29 + $0x208] sm:$0xff]  ;;  %v1906_v35 = vld [vmem:[%s2079_s29 + $0x200] sm:$0xff] }
  0xe5   : > { %v1569_v33 = vadd.f32 %v1568_v17, %v1567_v51  ;;  %v500_v9 = vadd.f32 %v499_v20, %v498_v11  ;;  %v632_v40 = vadd.f32 %v631_v49, %v630_v45  ;;  %v975_v63 = vsel %vm501_vm1, %v783_v7, 0.0  ;;  %v1904_v17 = vld [vmem:[%s2079_s29 + $0x218] sm:$0xff] }
  0xe6   : > { %v1473_v60 = vadd.f32 %v1472_v62, %v1377_v5  ;;  %v1381_v32 = vmul.f32 %v1903_v34, %v1162_v22  ;;  %v1572_v51 = vsel %vm501_vm1, %v1380_v43, 0.0  ;;  %v976_v7 = vadd.f32 %v975_v63, %v974_v3 }
  0xe7   : > { %v1571_v19 = vadd.f32 %v1570_v61, %v1569_v33  ;;  %v1172_v53 = vpop.permute.xlu1 %1171  ;;  %v1167_v55 = vpop.permute.xlu0 %1166  ;;  %v635_v62 = vcombine.low %v500_v9, %v632_v40  ;;  %v847_v61 = vadd.f32 %v846_v46, %v845_v28  ;;  %v1574_v33 = vsel %vm501_vm1, %v1382_v39, 0.0  ;;  %v432_v46 = vld [vmem:[#allocation2] sm:$0x3]  ;;  %v1908_v40 = vld [vmem:[%s2079_s29 + $0x228] sm:$0xff] }
  0xe8   : > { %v1474_v1 = vadd.f32 %v1473_v60, %v1379_v41  ;;  %v1386_v31 = vmul.f32 %v1904_v17, %v1172_v53  ;;  %v1384_v5 = vmul.f32 %v1905_v14, %v1167_v55  ;;  %v1383_v11 = vmul.f32 %v1906_v35, %v1167_v55  ;;  %v1907_v60 = vld [vmem:[%s2079_s29 + $0x210] sm:$0xff] }
  0xe9   : > { %v1573_v42 = vadd.f32 %v1572_v51, %v1571_v19  ;;  %v642_v43 = vrot.slane %v635_v62, %v2673_v24  ;;  %v848_v41 = vrot.slane %v847_v61, 2  ;;  %v1385_v19 = vmul.f32 %v1907_v60, %v1172_v53  ;;  %v1910_v51 = vld [vmem:[%s2079_s29 + $0x220] sm:$0xff] }
  0xea   : > { %v1475_v45 = vadd.f32 %v1474_v1, %v1381_v32  ;;  %v1576_v28 = vsel %vm501_vm1, %v1384_v5, 0.0  ;;  %v2852_v39 = vlaneseq  ;;  %v1578_v3 = vsel %vm501_vm1, %v1386_v31, 0.0  ;;  %v1909_v1 = vld [vmem:[%s2079_s29 + $0x238] sm:$0xff] }
  0xeb   : > { %v1575_v20 = vadd.f32 %v1574_v33, %v1573_v42  ;;  %v1182_v22 = vpop.permute.xlu1 %1181  ;;  %v1177_v49 = vpop.permute.xlu0 %1176  ;;  %v649_v32 = vrot.slane %v642_v43, %v2673_v24  ;;  %v977_v14 = vrot.slane %v976_v7, 4  ;;  %v849_v31 = vadd.f32 %v848_v41, %v847_v61 }
  0xec   : > { %v1476_v34 = vadd.f32 %v1475_v45, %v1383_v11  ;;  %vm2709_vm2 = vcmp.lt.s32.totalorder %v2852_v39, 144  ;;  %v1388_v63 = vmul.f32 %v1908_v40, %v1177_v49  ;;  %v1390_v53 = vmul.f32 %v1909_v1, %v1182_v22  ;;  %v1911_v11 = vld [vmem:[%s2079_s29 + $0x230] sm:$0xff] }
  0xed   : > { %v1577_v9 = vadd.f32 %v1576_v28, %v1575_v20  ;;  %v1387_v17 = vmul.f32 %v1910_v51, %v1177_v49  ;;  %v651_v35 = vadd.f32 %v649_v32, %v432_v46  ;;  %v1389_v45 = vmul.f32 %v1911_v11, %v1182_v22  ;;  %v1912_v28 = vld [vmem:[%s2079_s29 + $0x248] sm:$0xff]  ;;  %v1914_v46 = vld [vmem:[%s2079_s29 + $0x240] sm:$0xff]  ;;  %v1915_v1 = vld [vmem:[%s2079_s29 + $0x250] sm:$0xff] }
  0xee   : > { %v1477_v42 = vadd.f32 %v1476_v34, %v1385_v19  ;;  %v1580_v60 = vsel %vm501_vm1, %v1388_v63, 0.0  ;;  %v978_v49 = vadd.f32 %v977_v14, %v976_v7  ;;  %v1582_v19 = vsel %vm501_vm1, %v1390_v53, 0.0  ;;  %v1913_v34 = vld [vmem:[%s2079_s29 + $0x258] sm:$0xff] }
  0xef   : > { %v1579_v5 = vadd.f32 %v1578_v3, %v1577_v9  ;;  %v1192_v62 = vpop.permute.xlu1 %1191  ;;  %v1187_v33 = vpop.permute.xlu0 %1186  ;;  %656 = vst.msk [vmem:[#allocation2] sm:$0x3] %vm2709_vm2, %v651_v35  ;;  %v850_v63 = vrot.slane %v849_v31, 1  ;;  %v1917_v35 = vld [vmem:[%s2079_s29 + $0x278] sm:$0xff] }
  0xf0   : > { %v1478_v20 = vadd.f32 %v1477_v42, %v1387_v17  ;;  %v1392_v39 = vmul.f32 %v1912_v28, %v1187_v33  ;;  %v1394_v3 = vmul.f32 %v1913_v34, %v1192_v62  ;;  %v1391_v61 = vmul.f32 %v1914_v46, %v1187_v33  ;;  %v1916_v42 = vld [vmem:[%s2079_s29 + $0x268] sm:$0xff]  ;;  %v1919_v34 = vld [vmem:[%s2079_s29 + $0x270] sm:$0xff] }
  0xf1   : > { %v1581_v43 = vadd.f32 %v1580_v60, %v1579_v5  ;;  %v979_v32 = vrot.slane %v978_v49, 2  ;;  %v1393_v51 = vmul.f32 %v1915_v1, %v1192_v62  ;;  %v1921_v1 = vld [vmem:[%s2079_s29 + $0x298] sm:$0xff] }
  0xf2   : > { %v1479_v22 = vadd.f32 %v1478_v20, %v1389_v45  ;;  %v1584_v7 = vsel %vm501_vm1, %v1392_v39, 0.0  ;;  %v1586_v33 = vsel %vm501_vm1, %v1394_v3, 0.0  ;;  %v1918_v45 = vld [vmem:[%s2079_s29 + $0x260] sm:$0xff] }
  0xf3   : > { %v1583_v41 = vadd.f32 %v1582_v19, %v1581_v43  ;;  %v1202_v9 = vpop.permute.xlu1 %1201  ;;  %v1197_v40 = vpop.permute.xlu0 %1196  ;;  %v980_v5 = vadd.f32 %v979_v32, %v978_v49  ;;  %v851_v19 = vadd.f32 %v850_v63, %v849_v31 }
  0xf4   : > { %v1480_v17 = vadd.f32 %v1479_v22, %v1391_v61  ;;  %v1396_v14 = vmul.f32 %v1916_v42, %v1197_v40  ;;  %v1398_v11 = vmul.f32 %v1917_v35, %v1202_v9  ;;  %v1395_v20 = vmul.f32 %v1918_v45, %v1197_v40  ;;  %v1920_v22 = vld [vmem:[%s2079_s29 + $0x288] sm:$0xff] }
  0xf5   : > { %v1585_v53 = vadd.f32 %v1584_v7, %v1583_v41  ;;  %v981_v39 = vrot.slane %v980_v5, 1  ;;  %v1397_v46 = vmul.f32 %v1919_v34, %v1202_v9  ;;  %v1926_v34 = vld [vmem:[%s2079_s29 + $0x2a0] sm:$0xff] }
  0xf6   : > { %v1481_v60 = vadd.f32 %v1480_v17, %v1393_v51  ;;  %v1588_v49 = vsel %vm501_vm1, %v1396_v14, 0.0  ;;  %v1590_v40 = vsel %vm501_vm1, %v1398_v11, 0.0  ;;  %v1922_v17 = vld [vmem:[%s2079_s29 + $0x280] sm:$0xff] }
  0xf7   : > { %v1587_v43 = vadd.f32 %v1586_v33, %v1585_v53  ;;  %v1212_v62 = vpop.permute.xlu1 %1211  ;;  %v1207_v28 = vpop.permute.xlu0 %1206  ;;  %v982_v32 = vadd.f32 %v981_v39, %v980_v5  ;;  %v1923_v33 = vld [vmem:[%s2079_s29 + $0x290] sm:$0xff] }
  0xf8   : > { %v1482_v61 = vadd.f32 %v1481_v60, %v1395_v20  ;;  %v1400_v41 = vmul.f32 %v1920_v22, %v1207_v28  ;;  %v1402_v51 = vmul.f32 %v1921_v1, %v1212_v62  ;;  %v1399_v7 = vmul.f32 %v1922_v17, %v1207_v28  ;;  %v1924_v20 = vld [vmem:[%s2079_s29 + $0x2a8] sm:$0xff]  ;;  %v1925_v28 = vld [vmem:[%s2079_s29 + $0x2b8] sm:$0xff] }
  0xf9   : > { %v1589_v3 = vadd.f32 %v1588_v49, %v1587_v43  ;;  %v985_v42 = vcombine.low %v851_v19, %v982_v32  ;;  %v1401_v14 = vmul.f32 %v1923_v33, %v1212_v62  ;;  %v1928_v17 = vld [vmem:[%s2079_s29 + $0x2c8] sm:$0xff]  ;;  %v1930_v33 = vld [vmem:[%s2079_s29 + $0x2c0] sm:$0xff] }
  0xfa   : > { %v1483_v31 = vadd.f32 %v1482_v61, %v1397_v46  ;;  %v1592_v45 = vsel %vm501_vm1, %v1400_v41, 0.0  ;;  %v1594_v43 = vsel %vm501_vm1, %v1402_v51, 0.0  ;;  %v657_v61 = vld [vmem:[#allocation3] sm:$0x3]  ;;  %v1927_v41 = vld [vmem:[%s2079_s29 + $0x2b0] sm:$0xff] }
  0xfb   : > { %v1591_v63 = vadd.f32 %v1590_v40, %v1589_v3  ;;  %v1222_v9 = vpop.permute.xlu1 %1221  ;;  %v1217_v53 = vpop.permute.xlu0 %1216  ;;  %v992_v60 = vrot.slane %v985_v42, %v2673_v24 }
  0xfc   : > { %v1484_v35 = vadd.f32 %v1483_v31, %v1399_v7  ;;  %v1404_v11 = vmul.f32 %v1924_v20, %v1217_v53  ;;  %v1406_v39 = vmul.f32 %v1925_v28, %v1222_v9  ;;  %v1403_v46 = vmul.f32 %v1926_v34, %v1217_v53  ;;  %v1929_v53 = vld [vmem:[%s2079_s29 + $0x2d8] sm:$0xff] }
  0xfd   : > { %v1593_v5 = vadd.f32 %v1592_v45, %v1591_v63  ;;  %v999_v22 = vrot.slane %v992_v60, %v2673_v24  ;;  %v1405_v32 = vmul.f32 %v1927_v41, %v1222_v9  ;;  %v1931_v9 = vld [vmem:[%s2079_s29 + $0x2d0] sm:$0xff] }
  0xfe   : > { %v1485_v19 = vadd.f32 %v1484_v35, %v1401_v14  ;;  %v1596_v1 = vsel %vm501_vm1, %v1404_v11, 0.0  ;;  %v1598_v63 = vsel %vm501_vm1, %v1406_v39, 0.0 }
  0xff   : > { %v1595_v62 = vadd.f32 %v1594_v43, %v1593_v5  ;;  %v1232_v49 = vpop.permute.xlu1 %1231  ;;  %v1227_v3 = vpop.permute.xlu0 %1226  ;;  %v1001_v31 = vadd.f32 %v999_v22, %v657_v61 }
 0x100   : > { %v1486_v40 = vadd.f32 %v1485_v19, %v1403_v46  ;;  %v1408_v7 = vmul.f32 %v1928_v17, %v1227_v3  ;;  %v1410_v42 = vmul.f32 %v1929_v53, %v1232_v49  ;;  %v1407_v14 = vmul.f32 %v1930_v33, %v1227_v3  ;;  %v1932_v46 = vld [vmem:[%s2079_s29 + $0x2f8] sm:$0xff] }
 0x101   : > { %v1597_v51 = vadd.f32 %v1596_v1, %v1595_v62  ;;  %1002 = vst.msk [vmem:[#allocation3] sm:$0x3] %vm2709_vm2, %v1001_v31  ;;  %v1409_v11 = vmul.f32 %v1931_v9, %v1232_v49 }
 0x102   : > { %v1487_v35 = vadd.f32 %v1486_v40, %v1405_v32  ;;  %v1600_v43 = vsel %vm501_vm1, %v1408_v7, 0.0  ;;  %v1602_v34 = vsel %vm501_vm1, %v1410_v42, 0.0 }
 0x103   : > { %v1599_v45 = vadd.f32 %v1598_v63, %v1597_v51  ;;  %v1242_v5 = vpop.permute.xlu1 %1241  ;;  %v1237_v20 = vpop.permute.xlu0 %1236 }
 0x104   : > { %v1488_v60 = vadd.f32 %v1487_v35, %v1407_v14  ;;  %v1412_v39 = vmul.f32 %v1237_v20, %v2327_v58  ;;  %v1414_v19 = vmul.f32 %v1932_v46, %v1242_v5  ;;  %v1411_v61 = vmul.f32 %v1237_v20, %v2333_v0 }
 0x105   : > { %v1601_v28 = vadd.f32 %v1600_v43, %v1599_v45  ;;  %v1413_v32 = vmul.f32 %v1242_v5, %v2338_v4 }
 0x106   : > { %v1489_v62 = vadd.f32 %v1488_v60, %v1409_v11  ;;  %v1604_v49 = vsel %vm501_vm1, %v1412_v39, 0.0  ;;  %v1606_v58 = vsel %vm501_vm1, %v1414_v19, 0.0 }
 0x107   : > { %v1603_v3 = vadd.f32 %v1602_v34, %v1601_v28  ;;  %v1252_v22 = vpop.permute.xlu1 %1251  ;;  %v1247_v41 = vpop.permute.xlu0 %1246 }
 0x108   : > { %v1490_v40 = vadd.f32 %v1489_v62, %v1411_v61  ;;  %v1416_v51 = vmul.f32 %v1247_v41, %v2350_v15  ;;  %v1418_v17 = vmul.f32 %v1252_v22, %v2365_v26  ;;  %v1415_v7 = vmul.f32 %v1247_v41, %v2357_v21 }
 0x109   : > { %v1605_v1 = vadd.f32 %v1604_v49, %v1603_v3  ;;  %v1417_v42 = vmul.f32 %v1252_v22, %v2362_v25 }
 0x10a   : > { %v1491_v31 = vadd.f32 %v1490_v40, %v1413_v32  ;;  %v1608_v4 = vsel %vm501_vm1, %v1416_v51, 0.0  ;;  %v1610_v15 = vsel %vm501_vm1, %v1418_v17, 0.0 }
 0x10b   : > { %v1607_v0 = vadd.f32 %v1606_v58, %v1605_v1  ;;  %v1262_v63 = vpop.permute.xlu1 %1261  ;;  %v1257_v53 = vpop.permute.xlu0 %1256 }
 0x10c   : > { %v1492_v33 = vadd.f32 %v1491_v31, %v1415_v7  ;;  %v1420_v35 = vmul.f32 %v1257_v53, %v2383_v38  ;;  %v1422_v45 = vmul.f32 %v1262_v63, %v2380_v37  ;;  %v1419_v26 = vmul.f32 %v1257_v53, %v2391_v44 }
 0x10d   : > { %v1609_v14 = vadd.f32 %v1608_v4, %v1607_v0  ;;  %v1421_v11 = vmul.f32 %v1262_v63, %v2402_v54 }
 0x10e   : > { %v1493_v5 = vadd.f32 %v1492_v33, %v1417_v42  ;;  %v1612_v25 = vsel %vm501_vm1, %v1420_v35, 0.0  ;;  %v1614_v38 = vsel %vm501_vm1, %v1422_v45, 0.0 }
 0x10f   : > { %v1611_v21 = vadd.f32 %v1610_v15, %v1609_v14  ;;  %v1272_v20 = vpop.permute.xlu1 %1271  ;;  %v1267_v9 = vpop.permute.xlu0 %1266 }
 0x110   : > { %v1494_v60 = vadd.f32 %v1493_v5, %v1419_v26  ;;  %v1424_v28 = vmul.f32 %v1267_v9, %v2418_v6  ;;  %v1426_v39 = vmul.f32 %v1272_v20, %v2408_v59  ;;  %v1423_v37 = vmul.f32 %v1267_v9, %v2427_v12 }
 0x111   : > { %v1613_v43 = vadd.f32 %v1612_v25, %v1611_v21  ;;  %v1425_v61 = vmul.f32 %v1272_v20, %v2422_v10 }
 0x112   : > { %v1495_v34 = vadd.f32 %v1494_v60, %v1421_v11  ;;  %v1616_v54 = vsel %vm501_vm1, %v1424_v28, 0.0  ;;  %v1618_v6 = vsel %vm501_vm1, %v1426_v39, 0.0  ;;  %v2855_v11 = vld [vmem:[#allocation11_spill] sm:$0xff] }
 0x113   : > { %v1615_v44 = vadd.f32 %v1614_v38, %v1613_v43  ;;  %v1282_v46 = vpop.permute.xlu1 %1281  ;;  %v1277_v19 = vpop.permute.xlu0 %1276 }
 0x114   : > { %v1496_v62 = vadd.f32 %v1495_v34, %v1423_v37  ;;  %v1428_v22 = vmul.f32 %v1277_v19, %v2469_v2  ;;  %v1430_v41 = vmul.f32 %v1282_v46, %v2442_v30  ;;  %v1427_v59 = vmul.f32 %v1277_v19, %v2475_v13 }
 0x115   : > { %v1617_v3 = vadd.f32 %v1616_v54, %v1615_v44  ;;  %v1429_v1 = vmul.f32 %v1282_v46, %v2458_v52 }
 0x116   : > { %v1497_v32 = vadd.f32 %v1496_v62, %v1425_v61  ;;  %v1620_v10 = vsel %vm501_vm1, %v1428_v22, 0.0  ;;  %v1622_v2 = vsel %vm501_vm1, %v1430_v41, 0.0 }
 0x117   : > { %v1619_v12 = vadd.f32 %v1618_v6, %v1617_v3  ;;  %v1292_v40 = vpop.permute.xlu1 %1291  ;;  %v1287_v49 = vpop.permute.xlu0 %1286 }
 0x118   : > { %v1498_v51 = vadd.f32 %v1497_v32, %v1427_v59  ;;  %v1432_v17 = vmul.f32 %v1287_v49, %v2519_v29  ;;  %v1434_v7 = vmul.f32 %v1292_v40, %v2492_v48  ;;  %v1431_v30 = vmul.f32 %v1287_v49, %v2529_v47 }
 0x119   : > { %v1621_v58 = vadd.f32 %v1620_v10, %v1619_v12  ;;  %v1433_v53 = vmul.f32 %v1292_v40, %v2506_v8 }
 0x11a   : > { %v1499_v31 = vadd.f32 %v1498_v51, %v1429_v1  ;;  %v1624_v52 = vsel %vm501_vm1, %v1432_v17, 0.0  ;;  %v1626_v29 = vsel %vm501_vm1, %v1434_v7, 0.0  ;;  %v1003_v51 = vld [vmem:[#allocation4] sm:$0x3] }
 0x11b   : > { %v1623_v13 = vadd.f32 %v1622_v2, %v1621_v58  ;;  %v1302_v0 = vpop.permute.xlu1 %1301  ;;  %v1297_v63 = vpop.permute.xlu0 %1296 }
 0x11c   : > { %v1500_v42 = vadd.f32 %v1499_v31, %v1431_v30  ;;  %v1436_v4 = vmul.f32 %v1297_v63, %v2576_v16  ;;  %v1438_v14 = vmul.f32 %v1302_v0, %v2546_v27  ;;  %v1435_v48 = vmul.f32 %v1297_v63, %v2573_v50 }
 0x11d   : > { %v1625_v33 = vadd.f32 %v1624_v52, %v1623_v13  ;;  %v1437_v26 = vmul.f32 %v1302_v0, %v2555_v36 }
 0x11e   : > { %v1501_v35 = vadd.f32 %v1500_v42, %v1433_v53  ;;  %v1628_v8 = vsel %vm501_vm1, %v1436_v4, 0.0  ;;  %v1630_v16 = vsel %vm501_vm1, %v1438_v14, 0.0 }
 0x11f   : > { %v1627_v47 = vadd.f32 %v1626_v29, %v1625_v33  ;;  %v1312_v15 = vpop.permute.xlu1 %1311  ;;  %v1307_v45 = vpop.permute.xlu0 %1306 }
 0x120   : > { %v1502_v5 = vadd.f32 %v1501_v35, %v1435_v48  ;;  %v1440_v20 = vmul.f32 %v1307_v45, %v2622_v56  ;;  %v1442_v9 = vmul.f32 %v1312_v15, %v2597_v18  ;;  %v1439_v27 = vmul.f32 %v1307_v45, %v2855_v11  ;;  %v2856_v56 = vld [vmem:[#allocation12_spill] sm:$0xff] }
 0x121   : > { %v1629_v21 = vadd.f32 %v1628_v8, %v1627_v47  ;;  %v1441_v43 = vmul.f32 %v1312_v15, %v2614_v23 }
 0x122   : > { %v1503_v60 = vadd.f32 %v1502_v5, %v1437_v26  ;;  %v1632_v36 = vsel %vm501_vm1, %v1440_v20, 0.0  ;;  %v1634_v37 = vsel %vm501_vm1, %v1442_v9, 0.0 }
 0x123   : > { %v1631_v50 = vadd.f32 %v1630_v16, %v1629_v21  ;;  %v1317_v25 = vpop.permute.xlu0 %1316 }
 0x124   : > { %v1504_v28 = vadd.f32 %v1503_v60, %v1439_v27  ;;  %v1444_v38 = vmul.f32 %v1317_v25, %v2666_v57  ;;  %v1443_v34 = vmul.f32 %v1317_v25, %v2856_v56 }
 0x125   : > { %v1633_v39 = vadd.f32 %v1632_v36, %v1631_v50 }
 0x126   : > { %v1505_v44 = vadd.f32 %v1504_v28, %v1441_v43  ;;  %v1636_v19 = vsel %vm501_vm1, %v1444_v38, 0.0 }
 0x127   : > { %v1635_v46 = vadd.f32 %v1634_v37, %v1633_v39 }
 0x128   : > { %v1506_v18 = vadd.f32 %v1505_v44, %v1443_v34 }
 0x129   : > { %v1637_v61 = vadd.f32 %v1636_v19, %v1635_v46 }
 0x12a   : > { %v1507_v62 = vrot.slane %v1506_v18, 4 }
 0x12b   : > { %v1638_v54 = vrot.slane %v1637_v61, 4 }
 0x12c   : > { %v1508_v3 = vadd.f32 %v1507_v62, %v1506_v18 }
 0x12d   : > { %v1639_v23 = vadd.f32 %v1638_v54, %v1637_v61 }
 0x12e   : > { %v1509_v22 = vrot.slane %v1508_v3, 2 }
 0x12f   : > { %v1640_v6 = vrot.slane %v1639_v23, 2 }
 0x130   : > { %v1510_v41 = vadd.f32 %v1509_v22, %v1508_v3 }
 0x131   : > { %v1641_v59 = vadd.f32 %v1640_v6, %v1639_v23 }
 0x132   : > { %v1511_v57 = vrot.slane %v1510_v41, 1 }
 0x133   : > { %v1642_v32 = vrot.slane %v1641_v59, 1 }
 0x134   : > { %v1512_v12 = vadd.f32 %v1511_v57, %v1510_v41 }
 0x135   : > { %v1643_v40 = vadd.f32 %v1642_v32, %v1641_v59 }
 0x137   : > { %v1646_v49 = vcombine.low %v1512_v12, %v1643_v40 }
 0x139   : > { %v1653_v1 = vrot.slane %v1646_v49, %v2673_v24 }
 0x13b   : > { %v1660_v10 = vrot.slane %v1653_v1, %v2673_v24  ;;  %1667 = sbr.rel (%p1786_p3) target bundleno = 348 (0x15c), region = 44 }
 0x13d   : > { %v1662_v58 = vadd.f32 %v1660_v10, %v1003_v51 }
 0x13f   : > { %1663 = vst.msk [vmem:[#allocation4] sm:$0x3] %vm2709_vm2, %v1662_v58 }
 0x140   : > { %v1668_v17 = vld [vmem:[#allocation2] sm:$0x3]  ;;  %v1670_v2 = vld [vmem:[#allocation3] sm:$0x3]  ;;  %v1679_v63 = vstv %s1676_s6  ;;  %v1683_v33 = vstv %s1787_s7 }
 0x141   : > { %v1669_v7 = vmul.f32 0.000999001, %v1668_v17  ;;  %v1671_v30 = vmul.f32 0.000999001, %v1670_v2 }
 0x143   : > { %v1672_v31 = vmul.f32 %v1669_v7, %v1669_v7  ;;  %v1680_v53 = vmul.f32 %v1679_v63, %v1669_v7 }
 0x145   : > { %v1673_v13 = vsub.f32 %v1671_v30, %v1672_v31 }
 0x146   : > { %v1678_v24 = vld [vmem:[#allocation4] sm:$0x3] }
 0x147   : > { %v1674_v0 = vadd.f32 1e-05, %v1673_v13  ;;  %v1681_v42 = vsub.f32 %v1678_v24, %v1680_v53 }
 0x149   : > { %1933 = vrsqrt.f32 %v1674_v0 }
 0x156   : > { %v1934_v52 = vpop.eup %1933 }
 0x157   : > { %v1682_v4 = vmul.f32 %v1934_v52, %v1681_v42 }
 0x159   : > { %v1684_v29 = vadd.f32 %v1683_v33, %v1682_v4 }
 0x15b   : > { %1685 = vst.msk [vmem:[#allocation8] sm:$0x3] %vm2709_vm2, %v1684_v29 }
 0x15c PF: > { %p2817_p4 = scmp.eq.s32.totalorder %s1776_s15, 1  ;;  %s2010_s9 = smov [#allocation8]  }
 0x15d   : > { %s1696_s10 = sshll.u32 %s2010_s9, 4  ;;  %s1697_s10 = int_to_ptr.vmem [resolvable:$true] %s1696_s10 }
 0x15e   : > { %s1950_s11 = scalar_lea.vmem %s1697_s10, 32  ;;  %p1957_p8 = scmp.lt.s32.totalorder %s1697_s10, %s1697_s10 }
 0x15f   : > { %p1951_p5 = scmp.ne.s32.totalorder %s1697_s10, %s1950_s11  ;;  %p1958_p9 = scmp.lt.s32.totalorder %s1950_s11, %s1950_s11 }
 0x161   : > { %p1952_p6 = pnand %p1951_p5, %p2817_p4  ;;  %p1959_p10 = por %p1958_p9, %p1957_p8 }
 0x163   : > { %p1953_p7 = pneg %p1952_p6 }
 0x165   : > { %p1960_p11 = pnand %p1959_p10, %p1953_p7 }
 0x167   : > { %1963 = shalt.err (!%p1960_p11)
}
 0x168   : > { %1798 = dma.vmem_to_hbm [thread:$0]  (%p2817_p4), %s1697_s10, 32, %s2844_s3, [#allocation6]  }
 0x169   : > { %1991 = dma.done.wait (%p2817_p4), [#allocation6], 32  }
 0x16a   : > { %1993 = vsyncadd (%p2817_p4), [#allocation6], 4294967264 }
 0x16b PF: > { %s15_s14 = sadd.s32 1, %s2004_s14   ;;  %s2858_s12 = smov %s2000_s13 }
 0x16c   : > { %p12_p12 = scmp.ge.s32.totalorder %s15_s14, 4   ;;  %s2859_s13 = smov %s2861_s16 }
 0x16e   :  { %14 = sbr.rel (!%p12_p12) target bundleno = 3 (0x3), region = 76 }
 0x173   :  { %1709 = vsyncpa [#allocation6], 1 }
 0x174   :  { %1711 = vsyncpa [#allocation6 + $0x1], 1 }
 0x175   :  { %1712 = vsyncpa [#allocation7], 1 }
 0x176   :  { %1714 = vsyncpa [#allocation7 + $0x1], 1 }

</bundles_post_ra>
